<compile_context>
chip_gen: v5e
topology: v5e:2x2
jax: 0.10.0
libtpu: 0.0.40
codegen_flags: <defaults>
</compile_context>

<pallas_src>
import jax
import jax.numpy as jnp
from jax.experimental import pallas as pl
from jax.experimental.pallas import tpu as pltpu

INPUT_DIM = 63
OUT_DIM = 63
GT_DIM = 40


def _leaky(x):
    return jnp.where(x >= 0, x, 0.2 * x)


def _fdgru_kernel(bb_ref, inp_ref, reenc_ref, gt_ref, h0_ref,
                  iw1a_ref, w_l12_ref, gru_w_ref, wbb_ref,
                  wg1_ref, wgt1_ref, w2bd_ref, w3bd_ref, bias_ref,
                  out_ref, hout_ref, gru_ref):
    T, H = gru_ref.shape
    H1 = wg1_ref.shape[1]

    bb0 = bb_ref[0]
    bb1 = bb_ref[1]
    bb2 = bb_ref[2]

    # ---- row-packed biases ----
    ib1 = bias_ref[0:1, 0:H]
    ib2 = bias_ref[1:2, 0:H]
    bgx = bias_ref[2:3, 0:3 * H]                    # fused gate-input bias [r|z|n]
    bhn = bias_ref[3:4, 0:H]                        # hidden-side bias of the n gate
    hb1 = bias_ref[4:5, 0:H1]
    hb2 = bias_ref[5:6, 0:w2bd_ref.shape[1]]
    hb3 = bias_ref[6:7, 0:out_ref.shape[1]]

    iw1b = w_l12_ref[0]                             # (H, H)  inp_net L1 (reencoding block)
    iw2 = w_l12_ref[1]                              # (H, H)  inp_net L2
    wgx = gru_w_ref[0]                              # (H, 3H) fused iw3 @ W_ih
    whh = gru_w_ref[1]                              # (H, 3H) W_hh   [r|z|n]

    # bb_dims contributions as rank-1 adds (head block first -> lane-aligned)
    wbb = wbb_ref[...]                              # (3, H1 + H) = [heads | inp]
    bb_hd = bb0 * wbb[0:1, 0:H1] + bb1 * wbb[1:2, 0:H1] + bb2 * wbb[2:3, 0:H1]
    bb_in = (bb0 * wbb[0:1, H1:H1 + H] + bb1 * wbb[1:2, H1:H1 + H]
             + bb2 * wbb[2:3, H1:H1 + H])

    # ---- inp_net layers 1-2 (layer-3 folded into GRU input weights) ----
    y = _leaky(jnp.dot(inp_ref[...], iw1a_ref[...], preferred_element_type=jnp.float32)
               + jnp.dot(reenc_ref[...], iw1b, preferred_element_type=jnp.float32)
               + bb_in + ib1)
    y = _leaky(jnp.dot(y, iw2, preferred_element_type=jnp.float32) + ib2)

    # ---- GRU: one fused input-side matmul for all gates / timesteps ----
    gx = jnp.dot(y, wgx, preferred_element_type=jnp.float32) + bgx     # (T, 3H)

    h = h0_ref[...]                                                    # (1, H)
    for t in range(T):                      # fully unrolled, static row slices
        gh = jnp.dot(h, whh, preferred_element_type=jnp.float32)       # (1, 3H)
        rz = jax.nn.sigmoid(gx[t:t + 1, 0:2 * H] + gh[:, 0:2 * H])     # one sigmoid for r|z
        r = rz[:, 0:H]
        z = rz[:, H:2 * H]
        n = jnp.tanh(gx[t:t + 1, 2 * H:3 * H] + r * (gh[:, 2 * H:3 * H] + bhn))
        h = (1.0 - z) * n + z * h
        gru_ref[t:t + 1, :] = h
    hout_ref[...] = h

    # ---- fused heads: 3 lane-dense matmuls covering all 7 MLPs ----
    g = gru_ref[...]                                                   # (T, H)
    gt = gt_ref[...]                                                   # (T, 40)
    h1 = _leaky(jnp.dot(g, wg1_ref[...], preferred_element_type=jnp.float32)
                + jnp.dot(gt, wgt1_ref[...], preferred_element_type=jnp.float32)
                + bb_hd + hb1)
    h2 = _leaky(jnp.dot(h1, w2bd_ref[...], preferred_element_type=jnp.float32) + hb2)
    # layer-3 packed weights emit columns directly in the final concat order:
    # [cmd(7) | cube(33) | dim(3) | att(6) | sym(5) | squeeze(8) | align(1) | pad]
    out_ref[...] = (jnp.dot(h2, w3bd_ref[...], preferred_element_type=jnp.float32)
                    + hb3)


def _head_layout(H):
    # (mlp_idx, h1, h2, out_dim, out_col_offset, gt_col_range, bb_row_offset_in_W1)
    return [
        (1, H // 2, H // 4, 7,  0,  None,    None),      # cmd
        (2, H // 2, H // 4, 33, 7,  (0, 7),  None),      # cube    (clean_cmd)
        (3, H // 2, H // 4, 3,  40, None,    H),         # dim     (bb)
        (4, H // 2, H // 4, 1,  62, None,    H),         # align   (bb)
        (5, H,      H,      6,  43, (7, 29), None),      # att     (clean_cube[:22])
        (6, H // 2, H // 4, 5,  49, (7, 18), H + 11),    # sym     (clean_cube[:11], bb)
        (7, H // 2, H // 4, 8,  54, (7, 40), None),      # squeeze (clean_cube)
    ]


def pack_params(params, H):
    """Host-side packing of the per-MLP / GRU params into 9 kernel slabs."""
    f32 = jnp.float32
    mlps = params["mlps"]
    w_ih, w_hh, b_ih, b_hh = params["gru"]            # (H,3H),(H,3H),(1,3H),(1,3H)

    # inp_net: split layer-1 by input block (inp_seq | reencoding | bb_dims)
    iw1, ib1, iw2, ib2, iw3, ib3 = mlps[0]
    iw1a = iw1[:INPUT_DIM]
    iw1b = iw1[INPUT_DIM:INPUT_DIM + H]
    iw1c = iw1[INPUT_DIM + H:INPUT_DIM + H + 3]

    # Fold inp_net layer-3 into the GRU input-side weights (linear-into-linear).
    wgx = iw3 @ w_ih                                   # (H, 3H)
    bgx = ib3 @ w_ih + b_ih                            # (1, 3H)
    bgx = bgx.at[:, :2 * H].add(b_hh[:, :2 * H])       # fold b_hh for r,z gates
    bhn = b_hh[:, 2 * H:3 * H]                         # stays hidden-side (scaled by r)

    w_l12 = jnp.stack([iw1b, iw2])                     # (2, H, H)
    gru_w = jnp.stack([wgx, w_hh])                     # (2, H, 3H)

    # heads: lane-dense layer-1 + block-diagonal layer-2/3, lane-padded
    layout = _head_layout(H)
    H1 = sum(l[1] for l in layout)                     # 128 for H=32
    H2 = sum(l[2] for l in layout)                     # 80  for H=32
    H2P = max(128, -(-H2 // 128) * 128)
    OUTP = 128

    wg1 = jnp.zeros((H, H1), f32)
    wgt1 = jnp.zeros((GT_DIM, H1), f32)
    wbb1 = jnp.zeros((3, H1), f32)
    hb1 = jnp.zeros((1, H1), f32)
    w2bd = jnp.zeros((H1, H2P), f32)
    hb2 = jnp.zeros((1, H2P), f32)
    w3bd = jnp.zeros((H2P, OUTP), f32)
    hb3 = jnp.zeros((1, OUTP), f32)

    o1 = 0
    o2 = 0
    for (mi, h1, h2, od, oc, gtr, bbr) in layout:
        w1, b1, w2, b2, w3, b3 = mlps[mi]
        wg1 = wg1.at[:, o1:o1 + h1].set(w1[:H])
        if gtr is not None:
            lo, hi = gtr
            wgt1 = wgt1.at[lo:hi, o1:o1 + h1].set(w1[H:H + (hi - lo)])
        if bbr is not None:
            wbb1 = wbb1.at[:, o1:o1 + h1].set(w1[bbr:bbr + 3])
        hb1 = hb1.at[:, o1:o1 + h1].set(b1)
        w2bd = w2bd.at[o1:o1 + h1, o2:o2 + h2].set(w2)
        hb2 = hb2.at[:, o2:o2 + h2].set(b2)
        w3bd = w3bd.at[o2:o2 + h2, oc:oc + od].set(w3)
        hb3 = hb3.at[:, oc:oc + od].set(b3)
        o1 += h1
        o2 += h2

    # bb weights: [head layer-1 bb block | inp_net layer-1 bb block]
    wbb = jnp.concatenate([wbb1, iw1c], axis=1)        # (3, H1 + H)

    # all 1-row biases in a single (8, BW) slab
    BW = max(128, 3 * H, H1, H2P, OUTP)

    def row(v):
        r = jnp.zeros((1, BW), f32)
        return r.at[:, :v.shape[1]].set(v)

    biases = jnp.concatenate(
        [row(ib1), row(ib2), row(bgx), row(bhn),
         row(hb1), row(hb2), row(hb3), jnp.zeros((1, BW), f32)], axis=0)

    packed = [iw1a, w_l12, gru_w, wbb, wg1, wgt1, w2bd, w3bd, biases]
    meta = dict(H1=H1, H2P=H2P, OUTP=OUTP, BW=BW)
    return packed, meta


def fdgru_forward(inp_seq, reencoding, h0, bb_dims, gt_struct_seq, params):
    """inp_seq: (1,T,63)  reencoding: (1,T,H)  h0: (1,1,H)  bb_dims: (3,)
    gt_struct_seq: (1,T,40).  Returns (out (1,T,63), h (1,1,H))."""
    B, T, _ = inp_seq.shape
    assert B == 1, "FDGRU forward requires batch size 1 (bb_dims broadcast)"
    H = h0.shape[-1]

    packed, meta = pack_params(params, H)
    OUTP = meta["OUTP"]

    smem = pl.BlockSpec(memory_space=pltpu.MemorySpace.SMEM)
    vmem = pl.BlockSpec(memory_space=pltpu.MemorySpace.VMEM)

    out_p, h_out = pl.pallas_call(
        _fdgru_kernel,
        out_shape=(jax.ShapeDtypeStruct((T, OUTP), jnp.float32),
                   jax.ShapeDtypeStruct((1, H), jnp.float32)),
        in_specs=[smem] + [vmem] * (4 + len(packed)),
        out_specs=(vmem, vmem),
        scratch_shapes=[pltpu.VMEM((T, H), jnp.float32)],
    )(bb_dims, inp_seq[0], reencoding[0], gt_struct_seq[0], h0[0], *packed)

    return out_p[:, :OUT_DIM][None], h_out[None]


def fdgru_reference(inp_seq, reencoding, h0, bb_dims, gt, params):
    """Pure-JAX reference mirroring the PyTorch forward (teacher-forcing path)."""
    mlps = params["mlps"]
    w_ih, w_hh, b_ih, b_hh = params["gru"]
    T = inp_seq.shape[1]
    H = h0.shape[-1]

    def mlp(x, prm):
        w1, b1, w2, b2, w3, b3 = prm
        y = x @ w1 + b1
        y = jnp.where(y >= 0, y, 0.2 * y)
        y = y @ w2 + b2
        y = jnp.where(y >= 0, y, 0.2 * y)
        return y @ w3 + b3

    bb = jnp.broadcast_to(bb_dims.reshape(1, 3), (T, 3))
    x = mlp(jnp.concatenate([inp_seq[0], reencoding[0], bb], axis=1), mlps[0])
    h = h0[0]
    outs = []
    for t in range(T):
        gx = x[t:t + 1] @ w_ih + b_ih
        gh = h @ w_hh + b_hh
        r = jax.nn.sigmoid(gx[:, :H] + gh[:, :H])
        z = jax.nn.sigmoid(gx[:, H:2 * H] + gh[:, H:2 * H])
        n = jnp.tanh(gx[:, 2 * H:] + r * gh[:, 2 * H:])
        h = (1.0 - z) * n + z * h
        outs.append(h)
    g = jnp.concatenate(outs, axis=0)
    gt2 = gt[0]
    clean_cmd, clean_cube = gt2[:, :7], gt2[:, 7:40]
    cmd = mlp(g, mlps[1])
    cube = mlp(jnp.concatenate([g, clean_cmd], 1), mlps[2])
    dim = mlp(jnp.concatenate([g, bb], 1), mlps[3])
    align = mlp(jnp.concatenate([g, bb], 1), mlps[4])
    att = mlp(jnp.concatenate([g, clean_cube[:, :22]], 1), mlps[5])
    sym = mlp(jnp.concatenate([g, clean_cube[:, :11], bb], 1), mlps[6])
    sq = mlp(jnp.concatenate([g, clean_cube], 1), mlps[7])
    out = jnp.concatenate([cmd, cube, dim, att, sym, sq, align], 1)
    return out[None], h[None]


def make_params(key, H):
    # (in_dim, hidden1, hidden2, out_dim) for each MLP actually used in forward()
    specs = [
        (INPUT_DIM + H + 3, H, H, H),        # inp_net
        (H, H // 2, H // 4, 7),              # cmd_net
        (H + 7, H // 2, H // 4, 33),         # cube_net
        (H + 3, H // 2, H // 4, 3),          # dim_net
        (H + 3, H // 2, H // 4, 1),          # align_net
        (H + 22, H, H, 6),                   # att_net
        (H + 3 + 11, H // 2, H // 4, 5),     # sym_net
        (H + 33, H // 2, H // 4, 8),         # squeeze_net
    ]
    mlps = []
    for i, (ind, h1, h2, od) in enumerate(specs):
        ks = jax.random.split(jax.random.fold_in(key, i), 6)
        dims = [(ind, h1), (1, h1), (h1, h2), (1, h2), (h2, od), (1, od)]
        mlps.append(tuple(0.1 * jax.random.normal(ks[j], d, jnp.float32)
                          for j, d in enumerate(dims)))
    kg = jax.random.split(jax.random.fold_in(key, 100), 4)
    gru = (0.1 * jax.random.normal(kg[0], (H, 3 * H), jnp.float32),   # W_ih^T  [r|z|n]
           0.1 * jax.random.normal(kg[1], (H, 3 * H), jnp.float32),   # W_hh^T  [r|z|n]
           0.1 * jax.random.normal(kg[2], (1, 3 * H), jnp.float32),   # b_ih
           0.1 * jax.random.normal(kg[3], (1, 3 * H), jnp.float32))   # b_hh
    return {"mlps": mlps, "gru": gru}


if __name__ == "__main__":
    H, T = 32, 8
    key = jax.random.PRNGKey(0)
    k = jax.random.split(key, 9)

    inp_seq = jax.random.normal(k[0], (1, T, INPUT_DIM), jnp.float32)
    reencoding = jax.random.normal(k[1], (1, T, H), jnp.float32)
    h0 = jax.random.normal(k[2], (1, 1, H), jnp.float32)
    bb_dims = jax.random.uniform(k[3], (3,), jnp.float32)

    # gt_struct_seq: one-hot command (7) + three one-hot cube ids (11 each) = 40
    cmd_idx = jax.random.randint(k[4], (T,), 0, 7)
    c1 = jax.random.randint(k[5], (T,), 0, 11)
    c2 = jax.random.randint(k[6], (T,), 0, 11)
    c3 = jax.random.randint(k[7], (T,), 0, 11)
    gt_struct_seq = jnp.concatenate(
        [jax.nn.one_hot(cmd_idx, 7), jax.nn.one_hot(c1, 11),
         jax.nn.one_hot(c2, 11), jax.nn.one_hot(c3, 11)],
        axis=1).astype(jnp.float32)[None]                           # (1, T, 40)

    params = make_params(k[8], H)

    out, h_out = fdgru_forward(inp_seq, reencoding, h0, bb_dims, gt_struct_seq, params)
    out, h_out = jax.block_until_ready((out, h_out))

    ref_out, ref_h = fdgru_reference(inp_seq, reencoding, h0, bb_dims, gt_struct_seq, params)
    assert out.shape == (1, T, 63) and h_out.shape == (1, 1, H)
    assert jnp.allclose(out, ref_out, atol=1e-4, rtol=1e-4), (
        float(jnp.max(jnp.abs(out - ref_out))))
    assert jnp.allclose(h_out, ref_h, atol=1e-4, rtol=1e-4), (
        float(jnp.max(jnp.abs(h_out - ref_h))))

    print("KERNEL_OK")
</pallas_src>

<mosaic_0001>
module attributes {stable_mosaic.version = 11 : i64} {
  func.func @_fdgru_kernel(%arg0: memref<3xf32, #tpu.memory_space<smem>>, %arg1: memref<8x63xf32, #tpu.memory_space<vmem>>, %arg2: memref<8x32xf32, #tpu.memory_space<vmem>>, %arg3: memref<8x40xf32, #tpu.memory_space<vmem>>, %arg4: memref<1x32xf32, #tpu.memory_space<vmem>>, %arg5: memref<63x32xf32, #tpu.memory_space<vmem>>, %arg6: memref<2x32x32xf32, #tpu.memory_space<vmem>>, %arg7: memref<2x32x96xf32, #tpu.memory_space<vmem>>, %arg8: memref<3x160xf32, #tpu.memory_space<vmem>>, %arg9: memref<32x128xf32, #tpu.memory_space<vmem>>, %arg10: memref<40x128xf32, #tpu.memory_space<vmem>>, %arg11: memref<128x128xf32, #tpu.memory_space<vmem>>, %arg12: memref<128x128xf32, #tpu.memory_space<vmem>>, %arg13: memref<8x128xf32, #tpu.memory_space<vmem>>, %arg14: memref<8x128xf32, #tpu.memory_space<vmem>>, %arg15: memref<1x32xf32, #tpu.memory_space<vmem>>, %arg16: memref<8x32xf32, #tpu.memory_space<vmem>>) attributes {dimension_semantics = [], scalar_prefetch = 0 : i64, scratch_operands = 1 : i64, tpu.core_type = #tpu.core_type<tc>} {
    %c0 = arith.constant 0 : index
    %0 = memref.load %arg0[%c0] : memref<3xf32, #tpu.memory_space<smem>>
    %c1 = arith.constant 1 : index
    %1 = memref.load %arg0[%c1] : memref<3xf32, #tpu.memory_space<smem>>
    %c2 = arith.constant 2 : index
    %2 = memref.load %arg0[%c2] : memref<3xf32, #tpu.memory_space<smem>>
    %c0_0 = arith.constant 0 : index
    %c0_1 = arith.constant 0 : index
    %3 = vector.load %arg13[%c0_0, %c0_1] : memref<8x128xf32, #tpu.memory_space<vmem>>, vector<1x32xf32>
    %c1_2 = arith.constant 1 : index
    %c0_3 = arith.constant 0 : index
    %4 = vector.load %arg13[%c1_2, %c0_3] : memref<8x128xf32, #tpu.memory_space<vmem>>, vector<1x32xf32>
    %c2_4 = arith.constant 2 : index
    %c0_5 = arith.constant 0 : index
    %5 = vector.load %arg13[%c2_4, %c0_5] : memref<8x128xf32, #tpu.memory_space<vmem>>, vector<1x96xf32>
    %c3 = arith.constant 3 : index
    %c0_6 = arith.constant 0 : index
    %6 = vector.load %arg13[%c3, %c0_6] : memref<8x128xf32, #tpu.memory_space<vmem>>, vector<1x32xf32>
    %c4 = arith.constant 4 : index
    %c0_7 = arith.constant 0 : index
    %7 = vector.load %arg13[%c4, %c0_7] : memref<8x128xf32, #tpu.memory_space<vmem>>, vector<1x128xf32>
    %c5 = arith.constant 5 : index
    %c0_8 = arith.constant 0 : index
    %8 = vector.load %arg13[%c5, %c0_8] : memref<8x128xf32, #tpu.memory_space<vmem>>, vector<1x128xf32>
    %c6 = arith.constant 6 : index
    %c0_9 = arith.constant 0 : index
    %9 = vector.load %arg13[%c6, %c0_9] : memref<8x128xf32, #tpu.memory_space<vmem>>, vector<1x128xf32>
    %c0_10 = arith.constant 0 : index
    %c0_11 = arith.constant 0 : index
    %c0_12 = arith.constant 0 : index
    %10 = vector.load %arg6[%c0_10, %c0_11, %c0_12] : memref<2x32x32xf32, #tpu.memory_space<vmem>>, vector<1x32x32xf32>
    %11 = vector.shape_cast %10 : vector<1x32x32xf32> to vector<32x32xf32>
    %c1_13 = arith.constant 1 : index
    %c0_14 = arith.constant 0 : index
    %c0_15 = arith.constant 0 : index
    %12 = vector.load %arg6[%c1_13, %c0_14, %c0_15] : memref<2x32x32xf32, #tpu.memory_space<vmem>>, vector<1x32x32xf32>
    %13 = vector.shape_cast %12 : vector<1x32x32xf32> to vector<32x32xf32>
    %c0_16 = arith.constant 0 : index
    %c0_17 = arith.constant 0 : index
    %c0_18 = arith.constant 0 : index
    %14 = vector.load %arg7[%c0_16, %c0_17, %c0_18] : memref<2x32x96xf32, #tpu.memory_space<vmem>>, vector<1x32x96xf32>
    %15 = vector.shape_cast %14 : vector<1x32x96xf32> to vector<32x96xf32>
    %c1_19 = arith.constant 1 : index
    %c0_20 = arith.constant 0 : index
    %c0_21 = arith.constant 0 : index
    %16 = vector.load %arg7[%c1_19, %c0_20, %c0_21] : memref<2x32x96xf32, #tpu.memory_space<vmem>>, vector<1x32x96xf32>
    %17 = vector.shape_cast %16 : vector<1x32x96xf32> to vector<32x96xf32>
    %c0_22 = arith.constant 0 : index
    %c0_23 = arith.constant 0 : index
    %18 = vector.load %arg8[%c0_22, %c0_23] : memref<3x160xf32, #tpu.memory_space<vmem>>, vector<3x160xf32>
    %19 = vector.extract_strided_slice %18 {offsets = [0, 0], sizes = [1, 128], strides = [1, 1]} : vector<3x160xf32> to vector<1x128xf32>
    %20 = vector.broadcast %0 : f32 to vector<1x128xf32>
    %21 = arith.mulf %20, %19 : vector<1x128xf32>
    %22 = vector.extract_strided_slice %18 {offsets = [1, 0], sizes = [1, 128], strides = [1, 1]} : vector<3x160xf32> to vector<1x128xf32>
    %23 = vector.broadcast %1 : f32 to vector<1x128xf32>
    %24 = arith.mulf %23, %22 : vector<1x128xf32>
    %25 = arith.addf %21, %24 : vector<1x128xf32>
    %26 = vector.extract_strided_slice %18 {offsets = [2, 0], sizes = [1, 128], strides = [1, 1]} : vector<3x160xf32> to vector<1x128xf32>
    %27 = vector.broadcast %2 : f32 to vector<1x128xf32>
    %28 = arith.mulf %27, %26 : vector<1x128xf32>
    %29 = arith.addf %25, %28 : vector<1x128xf32>
    %30 = vector.extract_strided_slice %18 {offsets = [0, 128], sizes = [1, 32], strides = [1, 1]} : vector<3x160xf32> to vector<1x32xf32>
    %31 = vector.broadcast %0 : f32 to vector<1x32xf32>
    %32 = arith.mulf %31, %30 : vector<1x32xf32>
    %33 = vector.extract_strided_slice %18 {offsets = [1, 128], sizes = [1, 32], strides = [1, 1]} : vector<3x160xf32> to vector<1x32xf32>
    %34 = vector.broadcast %1 : f32 to vector<1x32xf32>
    %35 = arith.mulf %34, %33 : vector<1x32xf32>
    %36 = arith.addf %32, %35 : vector<1x32xf32>
    %37 = vector.extract_strided_slice %18 {offsets = [2, 128], sizes = [1, 32], strides = [1, 1]} : vector<3x160xf32> to vector<1x32xf32>
    %38 = vector.broadcast %2 : f32 to vector<1x32xf32>
    %39 = arith.mulf %38, %37 : vector<1x32xf32>
    %40 = arith.addf %36, %39 : vector<1x32xf32>
    %c0_24 = arith.constant 0 : index
    %c0_25 = arith.constant 0 : index
    %41 = vector.load %arg1[%c0_24, %c0_25] : memref<8x63xf32, #tpu.memory_space<vmem>>, vector<8x63xf32>
    %c0_26 = arith.constant 0 : index
    %c0_27 = arith.constant 0 : index
    %42 = vector.load %arg5[%c0_26, %c0_27] : memref<63x32xf32, #tpu.memory_space<vmem>>, vector<63x32xf32>
    %cst = arith.constant dense<0.000000e+00> : vector<8x32xf32>
    %43 = tpu.matmul %41, %42, %cst {dimension_numbers = #tpu.dot_dimension_numbers<[1], [0], [0], [1], [0, 0, 1, 1], [], []>} : vector<8x63xf32>, vector<63x32xf32>, vector<8x32xf32> -> vector<8x32xf32>
    %c0_28 = arith.constant 0 : index
    %c0_29 = arith.constant 0 : index
    %44 = vector.load %arg2[%c0_28, %c0_29] : memref<8x32xf32, #tpu.memory_space<vmem>>, vector<8x32xf32>
    %cst_30 = arith.constant dense<0.000000e+00> : vector<8x32xf32>
    %45 = tpu.matmul %44, %11, %cst_30 {dimension_numbers = #tpu.dot_dimension_numbers<[1], [0], [0], [1], [0, 0, 1, 1], [], []>} : vector<8x32xf32>, vector<32x32xf32>, vector<8x32xf32> -> vector<8x32xf32>
    %46 = arith.addf %43, %45 : vector<8x32xf32>
    %47 = vector.broadcast %40 : vector<1x32xf32> to vector<8x32xf32>
    %48 = arith.addf %46, %47 : vector<8x32xf32>
    %49 = vector.broadcast %3 : vector<1x32xf32> to vector<8x32xf32>
    %50 = arith.addf %48, %49 : vector<8x32xf32>
    %cst_31 = arith.constant 0.000000e+00 : f32
    %51 = vector.broadcast %cst_31 : f32 to vector<8x32xf32>
    %52 = arith.cmpf oge, %50, %51 : vector<8x32xf32>
    %cst_32 = arith.constant 2.000000e-01 : f32
    %53 = vector.broadcast %cst_32 : f32 to vector<8x32xf32>
    %54 = arith.mulf %53, %50 : vector<8x32xf32>
    %55 = arith.select %52, %50, %54 : vector<8x32xi1>, vector<8x32xf32>
    %cst_33 = arith.constant dense<0.000000e+00> : vector<8x32xf32>
    %56 = tpu.matmul %55, %13, %cst_33 {dimension_numbers = #tpu.dot_dimension_numbers<[1], [0], [0], [1], [0, 0, 1, 1], [], []>} : vector<8x32xf32>, vector<32x32xf32>, vector<8x32xf32> -> vector<8x32xf32>
    %57 = vector.broadcast %4 : vector<1x32xf32> to vector<8x32xf32>
    %58 = arith.addf %56, %57 : vector<8x32xf32>
    %cst_34 = arith.constant 0.000000e+00 : f32
    %59 = vector.broadcast %cst_34 : f32 to vector<8x32xf32>
    %60 = arith.cmpf oge, %58, %59 : vector<8x32xf32>
    %cst_35 = arith.constant 2.000000e-01 : f32
    %61 = vector.broadcast %cst_35 : f32 to vector<8x32xf32>
    %62 = arith.mulf %61, %58 : vector<8x32xf32>
    %63 = arith.select %60, %58, %62 : vector<8x32xi1>, vector<8x32xf32>
    %cst_36 = arith.constant dense<0.000000e+00> : vector<8x96xf32>
    %64 = tpu.matmul %63, %15, %cst_36 {dimension_numbers = #tpu.dot_dimension_numbers<[1], [0], [0], [1], [0, 0, 1, 1], [], []>} : vector<8x32xf32>, vector<32x96xf32>, vector<8x96xf32> -> vector<8x96xf32>
    %65 = vector.broadcast %5 : vector<1x96xf32> to vector<8x96xf32>
    %66 = arith.addf %64, %65 : vector<8x96xf32>
    %c0_37 = arith.constant 0 : index
    %c0_38 = arith.constant 0 : index
    %67 = vector.load %arg4[%c0_37, %c0_38] : memref<1x32xf32, #tpu.memory_space<vmem>>, vector<1x32xf32>
    %cst_39 = arith.constant dense<0.000000e+00> : vector<1x96xf32>
    %68 = tpu.matmul %67, %17, %cst_39 {dimension_numbers = #tpu.dot_dimension_numbers<[1], [0], [0], [1], [0, 0, 1, 1], [], []>} : vector<1x32xf32>, vector<32x96xf32>, vector<1x96xf32> -> vector<1x96xf32>
    %69 = vector.extract_strided_slice %66 {offsets = [0, 0], sizes = [1, 64], strides = [1, 1]} : vector<8x96xf32> to vector<1x64xf32>
    %70 = vector.extract_strided_slice %68 {offsets = [0, 0], sizes = [1, 64], strides = [1, 1]} : vector<1x96xf32> to vector<1x64xf32>
    %71 = arith.addf %69, %70 : vector<1x64xf32>
    %72 = arith.negf %71 : vector<1x64xf32>
    %73 = math.exp %72 : vector<1x64xf32>
    %cst_40 = arith.constant 1.000000e+00 : f32
    %74 = vector.broadcast %cst_40 : f32 to vector<1x64xf32>
    %75 = arith.addf %74, %73 : vector<1x64xf32>
    %76 = arith.divf %74, %75 : vector<1x64xf32>
    %77 = vector.extract_strided_slice %76 {offsets = [0, 0], sizes = [1, 32], strides = [1, 1]} : vector<1x64xf32> to vector<1x32xf32>
    %78 = vector.extract_strided_slice %76 {offsets = [0, 32], sizes = [1, 32], strides = [1, 1]} : vector<1x64xf32> to vector<1x32xf32>
    %79 = vector.extract_strided_slice %66 {offsets = [0, 64], sizes = [1, 32], strides = [1, 1]} : vector<8x96xf32> to vector<1x32xf32>
    %80 = vector.extract_strided_slice %68 {offsets = [0, 64], sizes = [1, 32], strides = [1, 1]} : vector<1x96xf32> to vector<1x32xf32>
    %81 = arith.addf %80, %6 : vector<1x32xf32>
    %82 = arith.mulf %77, %81 : vector<1x32xf32>
    %83 = arith.addf %79, %82 : vector<1x32xf32>
    %84 = math.tanh %83 : vector<1x32xf32>
    %cst_41 = arith.constant 1.000000e+00 : f32
    %85 = vector.broadcast %cst_41 : f32 to vector<1x32xf32>
    %86 = arith.subf %85, %78 : vector<1x32xf32>
    %87 = arith.mulf %86, %84 : vector<1x32xf32>
    %88 = arith.mulf %78, %67 : vector<1x32xf32>
    %89 = arith.addf %87, %88 : vector<1x32xf32>
    %c0_42 = arith.constant 0 : index
    %c0_43 = arith.constant 0 : index
    %90 = vector.load %arg16[%c0_42, %c0_43] : memref<8x32xf32, #tpu.memory_space<vmem>>, vector<1x32xf32>
    tpu.vector_store %arg16[%c0_42, %c0_43], %89 {strides = array<i32>} : memref<8x32xf32, #tpu.memory_space<vmem>>, vector<1x32xf32>,
    %cst_44 = arith.constant dense<0.000000e+00> : vector<1x96xf32>
    %91 = tpu.matmul %89, %17, %cst_44 {dimension_numbers = #tpu.dot_dimension_numbers<[1], [0], [0], [1], [0, 0, 1, 1], [], []>} : vector<1x32xf32>, vector<32x96xf32>, vector<1x96xf32> -> vector<1x96xf32>
    %92 = vector.extract_strided_slice %66 {offsets = [1, 0], sizes = [1, 64], strides = [1, 1]} : vector<8x96xf32> to vector<1x64xf32>
    %93 = vector.extract_strided_slice %91 {offsets = [0, 0], sizes = [1, 64], strides = [1, 1]} : vector<1x96xf32> to vector<1x64xf32>
    %94 = arith.addf %92, %93 : vector<1x64xf32>
    %95 = arith.negf %94 : vector<1x64xf32>
    %96 = math.exp %95 : vector<1x64xf32>
    %cst_45 = arith.constant 1.000000e+00 : f32
    %97 = vector.broadcast %cst_45 : f32 to vector<1x64xf32>
    %98 = arith.addf %97, %96 : vector<1x64xf32>
    %99 = arith.divf %97, %98 : vector<1x64xf32>
    %100 = vector.extract_strided_slice %99 {offsets = [0, 0], sizes = [1, 32], strides = [1, 1]} : vector<1x64xf32> to vector<1x32xf32>
    %101 = vector.extract_strided_slice %99 {offsets = [0, 32], sizes = [1, 32], strides = [1, 1]} : vector<1x64xf32> to vector<1x32xf32>
    %102 = vector.extract_strided_slice %66 {offsets = [1, 64], sizes = [1, 32], strides = [1, 1]} : vector<8x96xf32> to vector<1x32xf32>
    %103 = vector.extract_strided_slice %91 {offsets = [0, 64], sizes = [1, 32], strides = [1, 1]} : vector<1x96xf32> to vector<1x32xf32>
    %104 = arith.addf %103, %6 : vector<1x32xf32>
    %105 = arith.mulf %100, %104 : vector<1x32xf32>
    %106 = arith.addf %102, %105 : vector<1x32xf32>
    %107 = math.tanh %106 : vector<1x32xf32>
    %cst_46 = arith.constant 1.000000e+00 : f32
    %108 = vector.broadcast %cst_46 : f32 to vector<1x32xf32>
    %109 = arith.subf %108, %101 : vector<1x32xf32>
    %110 = arith.mulf %109, %107 : vector<1x32xf32>
    %111 = arith.mulf %101, %89 : vector<1x32xf32>
    %112 = arith.addf %110, %111 : vector<1x32xf32>
    %c1_47 = arith.constant 1 : index
    %c0_48 = arith.constant 0 : index
    %113 = vector.load %arg16[%c1_47, %c0_48] : memref<8x32xf32, #tpu.memory_space<vmem>>, vector<1x32xf32>
    tpu.vector_store %arg16[%c1_47, %c0_48], %112 {strides = array<i32>} : memref<8x32xf32, #tpu.memory_space<vmem>>, vector<1x32xf32>,
    %cst_49 = arith.constant dense<0.000000e+00> : vector<1x96xf32>
    %114 = tpu.matmul %112, %17, %cst_49 {dimension_numbers = #tpu.dot_dimension_numbers<[1], [0], [0], [1], [0, 0, 1, 1], [], []>} : vector<1x32xf32>, vector<32x96xf32>, vector<1x96xf32> -> vector<1x96xf32>
    %115 = vector.extract_strided_slice %66 {offsets = [2, 0], sizes = [1, 64], strides = [1, 1]} : vector<8x96xf32> to vector<1x64xf32>
    %116 = vector.extract_strided_slice %114 {offsets = [0, 0], sizes = [1, 64], strides = [1, 1]} : vector<1x96xf32> to vector<1x64xf32>
    %117 = arith.addf %115, %116 : vector<1x64xf32>
    %118 = arith.negf %117 : vector<1x64xf32>
    %119 = math.exp %118 : vector<1x64xf32>
    %cst_50 = arith.constant 1.000000e+00 : f32
    %120 = vector.broadcast %cst_50 : f32 to vector<1x64xf32>
    %121 = arith.addf %120, %119 : vector<1x64xf32>
    %122 = arith.divf %120, %121 : vector<1x64xf32>
    %123 = vector.extract_strided_slice %122 {offsets = [0, 0], sizes = [1, 32], strides = [1, 1]} : vector<1x64xf32> to vector<1x32xf32>
    %124 = vector.extract_strided_slice %122 {offsets = [0, 32], sizes = [1, 32], strides = [1, 1]} : vector<1x64xf32> to vector<1x32xf32>
    %125 = vector.extract_strided_slice %66 {offsets = [2, 64], sizes = [1, 32], strides = [1, 1]} : vector<8x96xf32> to vector<1x32xf32>
    %126 = vector.extract_strided_slice %114 {offsets = [0, 64], sizes = [1, 32], strides = [1, 1]} : vector<1x96xf32> to vector<1x32xf32>
    %127 = arith.addf %126, %6 : vector<1x32xf32>
    %128 = arith.mulf %123, %127 : vector<1x32xf32>
    %129 = arith.addf %125, %128 : vector<1x32xf32>
    %130 = math.tanh %129 : vector<1x32xf32>
    %cst_51 = arith.constant 1.000000e+00 : f32
    %131 = vector.broadcast %cst_51 : f32 to vector<1x32xf32>
    %132 = arith.subf %131, %124 : vector<1x32xf32>
    %133 = arith.mulf %132, %130 : vector<1x32xf32>
    %134 = arith.mulf %124, %112 : vector<1x32xf32>
    %135 = arith.addf %133, %134 : vector<1x32xf32>
    %c2_52 = arith.constant 2 : index
    %c0_53 = arith.constant 0 : index
    %136 = vector.load %arg16[%c2_52, %c0_53] : memref<8x32xf32, #tpu.memory_space<vmem>>, vector<1x32xf32>
    tpu.vector_store %arg16[%c2_52, %c0_53], %135 {strides = array<i32>} : memref<8x32xf32, #tpu.memory_space<vmem>>, vector<1x32xf32>,
    %cst_54 = arith.constant dense<0.000000e+00> : vector<1x96xf32>
    %137 = tpu.matmul %135, %17, %cst_54 {dimension_numbers = #tpu.dot_dimension_numbers<[1], [0], [0], [1], [0, 0, 1, 1], [], []>} : vector<1x32xf32>, vector<32x96xf32>, vector<1x96xf32> -> vector<1x96xf32>
    %138 = vector.extract_strided_slice %66 {offsets = [3, 0], sizes = [1, 64], strides = [1, 1]} : vector<8x96xf32> to vector<1x64xf32>
    %139 = vector.extract_strided_slice %137 {offsets = [0, 0], sizes = [1, 64], strides = [1, 1]} : vector<1x96xf32> to vector<1x64xf32>
    %140 = arith.addf %138, %139 : vector<1x64xf32>
    %141 = arith.negf %140 : vector<1x64xf32>
    %142 = math.exp %141 : vector<1x64xf32>
    %cst_55 = arith.constant 1.000000e+00 : f32
    %143 = vector.broadcast %cst_55 : f32 to vector<1x64xf32>
    %144 = arith.addf %143, %142 : vector<1x64xf32>
    %145 = arith.divf %143, %144 : vector<1x64xf32>
    %146 = vector.extract_strided_slice %145 {offsets = [0, 0], sizes = [1, 32], strides = [1, 1]} : vector<1x64xf32> to vector<1x32xf32>
    %147 = vector.extract_strided_slice %145 {offsets = [0, 32], sizes = [1, 32], strides = [1, 1]} : vector<1x64xf32> to vector<1x32xf32>
    %148 = vector.extract_strided_slice %66 {offsets = [3, 64], sizes = [1, 32], strides = [1, 1]} : vector<8x96xf32> to vector<1x32xf32>
    %149 = vector.extract_strided_slice %137 {offsets = [0, 64], sizes = [1, 32], strides = [1, 1]} : vector<1x96xf32> to vector<1x32xf32>
    %150 = arith.addf %149, %6 : vector<1x32xf32>
    %151 = arith.mulf %146, %150 : vector<1x32xf32>
    %152 = arith.addf %148, %151 : vector<1x32xf32>
    %153 = math.tanh %152 : vector<1x32xf32>
    %cst_56 = arith.constant 1.000000e+00 : f32
    %154 = vector.broadcast %cst_56 : f32 to vector<1x32xf32>
    %155 = arith.subf %154, %147 : vector<1x32xf32>
    %156 = arith.mulf %155, %153 : vector<1x32xf32>
    %157 = arith.mulf %147, %135 : vector<1x32xf32>
    %158 = arith.addf %156, %157 : vector<1x32xf32>
    %c3_57 = arith.constant 3 : index
    %c0_58 = arith.constant 0 : index
    %159 = vector.load %arg16[%c3_57, %c0_58] : memref<8x32xf32, #tpu.memory_space<vmem>>, vector<1x32xf32>
    tpu.vector_store %arg16[%c3_57, %c0_58], %158 {strides = array<i32>} : memref<8x32xf32, #tpu.memory_space<vmem>>, vector<1x32xf32>,
    %cst_59 = arith.constant dense<0.000000e+00> : vector<1x96xf32>
    %160 = tpu.matmul %158, %17, %cst_59 {dimension_numbers = #tpu.dot_dimension_numbers<[1], [0], [0], [1], [0, 0, 1, 1], [], []>} : vector<1x32xf32>, vector<32x96xf32>, vector<1x96xf32> -> vector<1x96xf32>
    %161 = vector.extract_strided_slice %66 {offsets = [4, 0], sizes = [1, 64], strides = [1, 1]} : vector<8x96xf32> to vector<1x64xf32>
    %162 = vector.extract_strided_slice %160 {offsets = [0, 0], sizes = [1, 64], strides = [1, 1]} : vector<1x96xf32> to vector<1x64xf32>
    %163 = arith.addf %161, %162 : vector<1x64xf32>
    %164 = arith.negf %163 : vector<1x64xf32>
    %165 = math.exp %164 : vector<1x64xf32>
    %cst_60 = arith.constant 1.000000e+00 : f32
    %166 = vector.broadcast %cst_60 : f32 to vector<1x64xf32>
    %167 = arith.addf %166, %165 : vector<1x64xf32>
    %168 = arith.divf %166, %167 : vector<1x64xf32>
    %169 = vector.extract_strided_slice %168 {offsets = [0, 0], sizes = [1, 32], strides = [1, 1]} : vector<1x64xf32> to vector<1x32xf32>
    %170 = vector.extract_strided_slice %168 {offsets = [0, 32], sizes = [1, 32], strides = [1, 1]} : vector<1x64xf32> to vector<1x32xf32>
    %171 = vector.extract_strided_slice %66 {offsets = [4, 64], sizes = [1, 32], strides = [1, 1]} : vector<8x96xf32> to vector<1x32xf32>
    %172 = vector.extract_strided_slice %160 {offsets = [0, 64], sizes = [1, 32], strides = [1, 1]} : vector<1x96xf32> to vector<1x32xf32>
    %173 = arith.addf %172, %6 : vector<1x32xf32>
    %174 = arith.mulf %169, %173 : vector<1x32xf32>
    %175 = arith.addf %171, %174 : vector<1x32xf32>
    %176 = math.tanh %175 : vector<1x32xf32>
    %cst_61 = arith.constant 1.000000e+00 : f32
    %177 = vector.broadcast %cst_61 : f32 to vector<1x32xf32>
    %178 = arith.subf %177, %170 : vector<1x32xf32>
    %179 = arith.mulf %178, %176 : vector<1x32xf32>
    %180 = arith.mulf %170, %158 : vector<1x32xf32>
    %181 = arith.addf %179, %180 : vector<1x32xf32>
    %c4_62 = arith.constant 4 : index
    %c0_63 = arith.constant 0 : index
    %182 = vector.load %arg16[%c4_62, %c0_63] : memref<8x32xf32, #tpu.memory_space<vmem>>, vector<1x32xf32>
    tpu.vector_store %arg16[%c4_62, %c0_63], %181 {strides = array<i32>} : memref<8x32xf32, #tpu.memory_space<vmem>>, vector<1x32xf32>,
    %cst_64 = arith.constant dense<0.000000e+00> : vector<1x96xf32>
    %183 = tpu.matmul %181, %17, %cst_64 {dimension_numbers = #tpu.dot_dimension_numbers<[1], [0], [0], [1], [0, 0, 1, 1], [], []>} : vector<1x32xf32>, vector<32x96xf32>, vector<1x96xf32> -> vector<1x96xf32>
    %184 = vector.extract_strided_slice %66 {offsets = [5, 0], sizes = [1, 64], strides = [1, 1]} : vector<8x96xf32> to vector<1x64xf32>
    %185 = vector.extract_strided_slice %183 {offsets = [0, 0], sizes = [1, 64], strides = [1, 1]} : vector<1x96xf32> to vector<1x64xf32>
    %186 = arith.addf %184, %185 : vector<1x64xf32>
    %187 = arith.negf %186 : vector<1x64xf32>
    %188 = math.exp %187 : vector<1x64xf32>
    %cst_65 = arith.constant 1.000000e+00 : f32
    %189 = vector.broadcast %cst_65 : f32 to vector<1x64xf32>
    %190 = arith.addf %189, %188 : vector<1x64xf32>
    %191 = arith.divf %189, %190 : vector<1x64xf32>
    %192 = vector.extract_strided_slice %191 {offsets = [0, 0], sizes = [1, 32], strides = [1, 1]} : vector<1x64xf32> to vector<1x32xf32>
    %193 = vector.extract_strided_slice %191 {offsets = [0, 32], sizes = [1, 32], strides = [1, 1]} : vector<1x64xf32> to vector<1x32xf32>
    %194 = vector.extract_strided_slice %66 {offsets = [5, 64], sizes = [1, 32], strides = [1, 1]} : vector<8x96xf32> to vector<1x32xf32>
    %195 = vector.extract_strided_slice %183 {offsets = [0, 64], sizes = [1, 32], strides = [1, 1]} : vector<1x96xf32> to vector<1x32xf32>
    %196 = arith.addf %195, %6 : vector<1x32xf32>
    %197 = arith.mulf %192, %196 : vector<1x32xf32>
    %198 = arith.addf %194, %197 : vector<1x32xf32>
    %199 = math.tanh %198 : vector<1x32xf32>
    %cst_66 = arith.constant 1.000000e+00 : f32
    %200 = vector.broadcast %cst_66 : f32 to vector<1x32xf32>
    %201 = arith.subf %200, %193 : vector<1x32xf32>
    %202 = arith.mulf %201, %199 : vector<1x32xf32>
    %203 = arith.mulf %193, %181 : vector<1x32xf32>
    %204 = arith.addf %202, %203 : vector<1x32xf32>
    %c5_67 = arith.constant 5 : index
    %c0_68 = arith.constant 0 : index
    %205 = vector.load %arg16[%c5_67, %c0_68] : memref<8x32xf32, #tpu.memory_space<vmem>>, vector<1x32xf32>
    tpu.vector_store %arg16[%c5_67, %c0_68], %204 {strides = array<i32>} : memref<8x32xf32, #tpu.memory_space<vmem>>, vector<1x32xf32>,
    %cst_69 = arith.constant dense<0.000000e+00> : vector<1x96xf32>
    %206 = tpu.matmul %204, %17, %cst_69 {dimension_numbers = #tpu.dot_dimension_numbers<[1], [0], [0], [1], [0, 0, 1, 1], [], []>} : vector<1x32xf32>, vector<32x96xf32>, vector<1x96xf32> -> vector<1x96xf32>
    %207 = vector.extract_strided_slice %66 {offsets = [6, 0], sizes = [1, 64], strides = [1, 1]} : vector<8x96xf32> to vector<1x64xf32>
    %208 = vector.extract_strided_slice %206 {offsets = [0, 0], sizes = [1, 64], strides = [1, 1]} : vector<1x96xf32> to vector<1x64xf32>
    %209 = arith.addf %207, %208 : vector<1x64xf32>
    %210 = arith.negf %209 : vector<1x64xf32>
    %211 = math.exp %210 : vector<1x64xf32>
    %cst_70 = arith.constant 1.000000e+00 : f32
    %212 = vector.broadcast %cst_70 : f32 to vector<1x64xf32>
    %213 = arith.addf %212, %211 : vector<1x64xf32>
    %214 = arith.divf %212, %213 : vector<1x64xf32>
    %215 = vector.extract_strided_slice %214 {offsets = [0, 0], sizes = [1, 32], strides = [1, 1]} : vector<1x64xf32> to vector<1x32xf32>
    %216 = vector.extract_strided_slice %214 {offsets = [0, 32], sizes = [1, 32], strides = [1, 1]} : vector<1x64xf32> to vector<1x32xf32>
    %217 = vector.extract_strided_slice %66 {offsets = [6, 64], sizes = [1, 32], strides = [1, 1]} : vector<8x96xf32> to vector<1x32xf32>
    %218 = vector.extract_strided_slice %206 {offsets = [0, 64], sizes = [1, 32], strides = [1, 1]} : vector<1x96xf32> to vector<1x32xf32>
    %219 = arith.addf %218, %6 : vector<1x32xf32>
    %220 = arith.mulf %215, %219 : vector<1x32xf32>
    %221 = arith.addf %217, %220 : vector<1x32xf32>
    %222 = math.tanh %221 : vector<1x32xf32>
    %cst_71 = arith.constant 1.000000e+00 : f32
    %223 = vector.broadcast %cst_71 : f32 to vector<1x32xf32>
    %224 = arith.subf %223, %216 : vector<1x32xf32>
    %225 = arith.mulf %224, %222 : vector<1x32xf32>
    %226 = arith.mulf %216, %204 : vector<1x32xf32>
    %227 = arith.addf %225, %226 : vector<1x32xf32>
    %c6_72 = arith.constant 6 : index
    %c0_73 = arith.constant 0 : index
    %228 = vector.load %arg16[%c6_72, %c0_73] : memref<8x32xf32, #tpu.memory_space<vmem>>, vector<1x32xf32>
    tpu.vector_store %arg16[%c6_72, %c0_73], %227 {strides = array<i32>} : memref<8x32xf32, #tpu.memory_space<vmem>>, vector<1x32xf32>,
    %cst_74 = arith.constant dense<0.000000e+00> : vector<1x96xf32>
    %229 = tpu.matmul %227, %17, %cst_74 {dimension_numbers = #tpu.dot_dimension_numbers<[1], [0], [0], [1], [0, 0, 1, 1], [], []>} : vector<1x32xf32>, vector<32x96xf32>, vector<1x96xf32> -> vector<1x96xf32>
    %230 = vector.extract_strided_slice %66 {offsets = [7, 0], sizes = [1, 64], strides = [1, 1]} : vector<8x96xf32> to vector<1x64xf32>
    %231 = vector.extract_strided_slice %229 {offsets = [0, 0], sizes = [1, 64], strides = [1, 1]} : vector<1x96xf32> to vector<1x64xf32>
    %232 = arith.addf %230, %231 : vector<1x64xf32>
    %233 = arith.negf %232 : vector<1x64xf32>
    %234 = math.exp %233 : vector<1x64xf32>
    %cst_75 = arith.constant 1.000000e+00 : f32
    %235 = vector.broadcast %cst_75 : f32 to vector<1x64xf32>
    %236 = arith.addf %235, %234 : vector<1x64xf32>
    %237 = arith.divf %235, %236 : vector<1x64xf32>
    %238 = vector.extract_strided_slice %237 {offsets = [0, 0], sizes = [1, 32], strides = [1, 1]} : vector<1x64xf32> to vector<1x32xf32>
    %239 = vector.extract_strided_slice %237 {offsets = [0, 32], sizes = [1, 32], strides = [1, 1]} : vector<1x64xf32> to vector<1x32xf32>
    %240 = vector.extract_strided_slice %66 {offsets = [7, 64], sizes = [1, 32], strides = [1, 1]} : vector<8x96xf32> to vector<1x32xf32>
    %241 = vector.extract_strided_slice %229 {offsets = [0, 64], sizes = [1, 32], strides = [1, 1]} : vector<1x96xf32> to vector<1x32xf32>
    %242 = arith.addf %241, %6 : vector<1x32xf32>
    %243 = arith.mulf %238, %242 : vector<1x32xf32>
    %244 = arith.addf %240, %243 : vector<1x32xf32>
    %245 = math.tanh %244 : vector<1x32xf32>
    %cst_76 = arith.constant 1.000000e+00 : f32
    %246 = vector.broadcast %cst_76 : f32 to vector<1x32xf32>
    %247 = arith.subf %246, %239 : vector<1x32xf32>
    %248 = arith.mulf %247, %245 : vector<1x32xf32>
    %249 = arith.mulf %239, %227 : vector<1x32xf32>
    %250 = arith.addf %248, %249 : vector<1x32xf32>
    %c7 = arith.constant 7 : index
    %c0_77 = arith.constant 0 : index
    %251 = vector.load %arg16[%c7, %c0_77] : memref<8x32xf32, #tpu.memory_space<vmem>>, vector<1x32xf32>
    tpu.vector_store %arg16[%c7, %c0_77], %250 {strides = array<i32>} : memref<8x32xf32, #tpu.memory_space<vmem>>, vector<1x32xf32>,
    %c0_78 = arith.constant 0 : index
    %c0_79 = arith.constant 0 : index
    %252 = vector.load %arg15[%c0_78, %c0_79] : memref<1x32xf32, #tpu.memory_space<vmem>>, vector<1x32xf32>
    tpu.vector_store %arg15[%c0_78, %c0_79], %250 {strides = array<i32>} : memref<1x32xf32, #tpu.memory_space<vmem>>, vector<1x32xf32>,
    %c0_80 = arith.constant 0 : index
    %c0_81 = arith.constant 0 : index
    %253 = vector.load %arg16[%c0_80, %c0_81] : memref<8x32xf32, #tpu.memory_space<vmem>>, vector<8x32xf32>
    %c0_82 = arith.constant 0 : index
    %c0_83 = arith.constant 0 : index
    %254 = vector.load %arg3[%c0_82, %c0_83] : memref<8x40xf32, #tpu.memory_space<vmem>>, vector<8x40xf32>
    %c0_84 = arith.constant 0 : index
    %c0_85 = arith.constant 0 : index
    %255 = vector.load %arg9[%c0_84, %c0_85] : memref<32x128xf32, #tpu.memory_space<vmem>>, vector<32x128xf32>
    %cst_86 = arith.constant dense<0.000000e+00> : vector<8x128xf32>
    %256 = tpu.matmul %253, %255, %cst_86 {dimension_numbers = #tpu.dot_dimension_numbers<[1], [0], [0], [1], [0, 0, 1, 1], [], []>} : vector<8x32xf32>, vector<32x128xf32>, vector<8x128xf32> -> vector<8x128xf32>
    %c0_87 = arith.constant 0 : index
    %c0_88 = arith.constant 0 : index
    %257 = vector.load %arg10[%c0_87, %c0_88] : memref<40x128xf32, #tpu.memory_space<vmem>>, vector<40x128xf32>
    %cst_89 = arith.constant dense<0.000000e+00> : vector<8x128xf32>
    %258 = tpu.matmul %254, %257, %cst_89 {dimension_numbers = #tpu.dot_dimension_numbers<[1], [0], [0], [1], [0, 0, 1, 1], [], []>} : vector<8x40xf32>, vector<40x128xf32>, vector<8x128xf32> -> vector<8x128xf32>
    %259 = arith.addf %256, %258 : vector<8x128xf32>
    %260 = vector.broadcast %29 : vector<1x128xf32> to vector<8x128xf32>
    %261 = arith.addf %259, %260 : vector<8x128xf32>
    %262 = vector.broadcast %7 : vector<1x128xf32> to vector<8x128xf32>
    %263 = arith.addf %261, %262 : vector<8x128xf32>
    %cst_90 = arith.constant 0.000000e+00 : f32
    %264 = vector.broadcast %cst_90 : f32 to vector<8x128xf32>
    %265 = arith.cmpf oge, %263, %264 : vector<8x128xf32>
    %cst_91 = arith.constant 2.000000e-01 : f32
    %266 = vector.broadcast %cst_91 : f32 to vector<8x128xf32>
    %267 = arith.mulf %266, %263 : vector<8x128xf32>
    %268 = arith.select %265, %263, %267 : vector<8x128xi1>, vector<8x128xf32>
    %c0_92 = arith.constant 0 : index
    %c0_93 = arith.constant 0 : index
    %269 = vector.load %arg11[%c0_92, %c0_93] : memref<128x128xf32, #tpu.memory_space<vmem>>, vector<128x128xf32>
    %cst_94 = arith.constant dense<0.000000e+00> : vector<8x128xf32>
    %270 = tpu.matmul %268, %269, %cst_94 {dimension_numbers = #tpu.dot_dimension_numbers<[1], [0], [0], [1], [0, 0, 1, 1], [], []>} : vector<8x128xf32>, vector<128x128xf32>, vector<8x128xf32> -> vector<8x128xf32>
    %271 = vector.broadcast %8 : vector<1x128xf32> to vector<8x128xf32>
    %272 = arith.addf %270, %271 : vector<8x128xf32>
    %cst_95 = arith.constant 0.000000e+00 : f32
    %273 = vector.broadcast %cst_95 : f32 to vector<8x128xf32>
    %274 = arith.cmpf oge, %272, %273 : vector<8x128xf32>
    %cst_96 = arith.constant 2.000000e-01 : f32
    %275 = vector.broadcast %cst_96 : f32 to vector<8x128xf32>
    %276 = arith.mulf %275, %272 : vector<8x128xf32>
    %277 = arith.select %274, %272, %276 : vector<8x128xi1>, vector<8x128xf32>
    %c0_97 = arith.constant 0 : index
    %c0_98 = arith.constant 0 : index
    %278 = vector.load %arg12[%c0_97, %c0_98] : memref<128x128xf32, #tpu.memory_space<vmem>>, vector<128x128xf32>
    %cst_99 = arith.constant dense<0.000000e+00> : vector<8x128xf32>
    %279 = tpu.matmul %277, %278, %cst_99 {dimension_numbers = #tpu.dot_dimension_numbers<[1], [0], [0], [1], [0, 0, 1, 1], [], []>} : vector<8x128xf32>, vector<128x128xf32>, vector<8x128xf32> -> vector<8x128xf32>
    %280 = vector.broadcast %9 : vector<1x128xf32> to vector<8x128xf32>
    %281 = arith.addf %279, %280 : vector<8x128xf32>
    %c0_100 = arith.constant 0 : index
    %c0_101 = arith.constant 0 : index
    %282 = vector.load %arg14[%c0_100, %c0_101] : memref<8x128xf32, #tpu.memory_space<vmem>>, vector<8x128xf32>
    tpu.vector_store %arg14[%c0_100, %c0_101], %281 {strides = array<i32>} : memref<8x128xf32, #tpu.memory_space<vmem>>, vector<8x128xf32>,
    return
  }
}

</mosaic_0001>

<bundles_post_ra>
// kernel: tpu_custom_call.1
= control target key start
LH: loop header
LB: loop body
LE: loop exit
PB: predicated region body
PF: predicated region fallthrough
CT: control target
= control target key end

     0   :  { %21 = vsyncpa [#allocation6], 0  ;;  %s1988_s0 = inlined_call_operand.vmem [shape: f32[3], index: 0, kind: input, shape index: {}]   ;;  %s1989_s1 = inlined_call_operand.hbm [shape: f32[8,63], index: 1, kind: input, shape index: {}]   ;;  %s1990_s2 = inlined_call_operand.hbm [shape: f32[8,32], index: 2, kind: input, shape index: {}]   ;;  %s1991_s3 = inlined_call_operand.hbm [shape: f32[8,40], index: 3, kind: input, shape index: {}]   ;;  %s1992_s4 = inlined_call_operand.hbm [shape: f32[1,32], index: 4, kind: input, shape index: {}]   ;;  %s1993_s5 = inlined_call_operand.vmem [shape: f32[63,32], index: 5, kind: input, shape index: {}]   ;;  %s1994_s6 = inlined_call_operand.vmem [shape: f32[2,32,32], index: 6, kind: input, shape index: {}]   ;;  %s1995_s7 = inlined_call_operand.hbm [shape: f32[2,32,96], index: 7, kind: input, shape index: {}]   ;;  %s1996_s8 = inlined_call_operand.hbm [shape: f32[3,160], index: 8, kind: input, shape index: {}]   ;;  %s1997_s9 = inlined_call_operand.hbm [shape: f32[32,128], index: 9, kind: input, shape index: {}]   ;;  %s1998_s10 = inlined_call_operand.vmem [shape: f32[40,128], index: 10, kind: input, shape index: {}]   ;;  %s1999_s11 = inlined_call_operand.hbm [shape: f32[128,128], index: 11, kind: input, shape index: {}]   ;;  %s2000_s12 = inlined_call_operand.hbm [shape: f32[128,128], index: 12, kind: input, shape index: {}]   ;;  %s2001_s13 = inlined_call_operand.hbm [shape: f32[8,128], index: 13, kind: input, shape index: {}]   ;;  %s2002_s14 = inlined_call_operand.hbm [shape: f32[8,128], index: 14, kind: output, shape index: {0}]   ;;  %s2003_s15 = inlined_call_operand.hbm [shape: f32[1,32], index: 15, kind: output, shape index: {1}]  }
   0x1   :  { %22 = vsyncpa [#allocation4], 0 }
   0x2   :  { %23 = vsyncpa [#allocation9], 0 }
   0x3   :  { %24 = vsyncpa [#allocation12], 0 }
   0x4   :  { %25 = vsyncpa [#allocation15], 0 }
   0x5   :  { %26 = vsyncpa [#allocation18], 0 }
   0x6   :  { %27 = vsyncpa [#allocation21], 0 }
   0x7   :  { %28 = vsyncpa [#allocation5], 0  ;;  %s55_s20 = sshll.u32 %s1990_s2, 4  ;;  %s56_s20 = int_to_ptr.hbm [resolvable:$true] %s55_s20 }
   0x8   :  { %29 = vsyncpa [#allocation24], 0  ;;  %s1611_s21 = smov [#allocation8]   ;;  %s77_s25 = sshll.u32 %s1992_s4, 4  ;;  %s78_s25 = int_to_ptr.hbm [resolvable:$true] %s77_s25 }
   0x9   :  { %s57_s22 = sshll.u32 %s1611_s21, 4  ;;  %s1612_s26 = smov [#allocation11]   ;;  %s58_s22 = int_to_ptr.vmem [resolvable:$true] %s57_s22 }
   0xa   :  { %60 = dma.hbm_to_vmem [thread:$0]  %s56_s20, 128, %s58_s22, [#allocation9]  }
   0xb   :  { %s79_s27 = sshll.u32 %s1612_s26, 4  ;;  %s105_s30 = sshll.u32 %s1996_s8, 4  ;;  %s80_s27 = int_to_ptr.vmem [resolvable:$true] %s79_s27  ;;  %s106_s30 = int_to_ptr.hbm [resolvable:$true] %s105_s30 }
   0xc   :  { %82 = dma.hbm_to_vmem [thread:$0]  %s78_s25, 16, %s80_s27, [#allocation12]  }
   0xd   :  { %s1613_s2 = smov [#allocation14]   ;;  %s130_s19 = sshll.u32 %s1999_s11, 4  ;;  %s131_s19 = int_to_ptr.hbm [resolvable:$true] %s130_s19 }
   0xe   :  { %s107_s16 = sshll.u32 %s1613_s2, 4  ;;  %s1614_s4 = smov [#allocation17]   ;;  %s108_s16 = int_to_ptr.vmem [resolvable:$true] %s107_s16 }
   0xf   :  { %110 = dma.hbm_to_vmem [thread:$0]  %s106_s30, 128, %s108_s16, [#allocation15]  }
  0x10   :  { %s132_s20 = sshll.u32 %s1614_s4, 4  ;;  %s35_s23 = sshll.u32 %s1988_s0, 4  ;;  %s133_s20 = int_to_ptr.vmem [resolvable:$true] %s132_s20  ;;  %s36_s23 = int_to_ptr.vmem [resolvable:$true] %s35_s23 }
  0x11   :  { %s1615_s8 = smov 128   ;;  %s1616_s24 = smov 8  }
  0x12   :  { %138 = dma.hbm_to_vmem [thread:$0]  %s131_s19, 2048, %s133_s20, [#allocation18], %s1615_s8, %s1615_s8, %s1616_s24  }
  0x13   :  { %s44_s11 = sshll.u32 %s1989_s1, 4  ;;  %s1617_s27 = smov [#allocation3]   ;;  %s45_s11 = int_to_ptr.hbm [resolvable:$true] %s44_s11 }
  0x14   :  { %38 = dma.vmem_to_smem %s36_s23, 16, %s1617_s27, [#allocation6]  }
  0x15   :  { %s1618_s28 = smov [#allocation7]   ;;  %s66_s0 = sshll.u32 %s1991_s3, 4  ;;  %s67_s0 = int_to_ptr.hbm [resolvable:$true] %s66_s0 }
  0x16   :  { %s46_s29 = sshll.u32 %s1618_s28, 4  ;;  %s91_s18 = sshll.u32 %s1995_s7, 4  ;;  %s47_s29 = int_to_ptr.vmem [resolvable:$true] %s46_s29  ;;  %s92_s18 = int_to_ptr.hbm [resolvable:$true] %s91_s18 }
  0x17   :  { %49 = dma.hbm_to_vmem [thread:$0]  %s45_s11, 128, %s47_s29, [#allocation4]  }
  0x18   :  { %s1619_s19 = smov [#allocation10]   ;;  %s1620_s1 = smov [#allocation13]  }
  0x19   :  { %s68_s4 = sshll.u32 %s1619_s19, 4  ;;  %s93_s20 = sshll.u32 %s1620_s1, 4  ;;  %s69_s4 = int_to_ptr.vmem [resolvable:$true] %s68_s4  ;;  %s94_s20 = int_to_ptr.vmem [resolvable:$true] %s93_s20 }
  0x1a   :  { %71 = dma.hbm_to_vmem [thread:$0]  %s67_s0, 128, %s69_s4, [#allocation9]  }
  0x1b   :  { %s115_s23 = sshll.u32 %s1997_s9, 4  ;;  %s143_s7 = sshll.u32 %s2000_s12, 4  ;;  %s116_s23 = int_to_ptr.hbm [resolvable:$true] %s115_s23  ;;  %s144_s7 = int_to_ptr.hbm [resolvable:$true] %s143_s7 }
  0x1c   :  { %99 = dma.hbm_to_vmem [thread:$0]  %s92_s18, 1024, %s94_s20, [#allocation12], %s1615_s8, %s1615_s8, %s1616_s24  }
  0x1d   :  { %s1621_s26 = smov [#allocation16]   ;;  %s1622_s27 = smov [#allocation19]  }
  0x1e   :  { %s117_s11 = sshll.u32 %s1621_s26, 4  ;;  %s145_s9 = sshll.u32 %s1622_s27, 4  ;;  %s118_s11 = int_to_ptr.vmem [resolvable:$true] %s117_s11  ;;  %s146_s9 = int_to_ptr.vmem [resolvable:$true] %s145_s9 }
  0x1f   :  { %123 = dma.hbm_to_vmem [thread:$0]  %s116_s23, 512, %s118_s11, [#allocation15], %s1615_s8, %s1615_s8, %s1616_s24  }
  0x20   :  { %s157_s30 = sshll.u32 %s2001_s13, 4  ;;  %s1623_s12 = smov [#allocation20]   ;;  %s158_s30 = int_to_ptr.hbm [resolvable:$true] %s157_s30 }
  0x21   :  { %151 = dma.hbm_to_vmem [thread:$0]  %s144_s7, 2048, %s146_s9, [#allocation18], %s1615_s8, %s1615_s8, %s1616_s24  }
  0x22   :  { %s159_s2 = sshll.u32 %s1623_s12, 4  ;;  %s160_s2 = int_to_ptr.vmem [resolvable:$true] %s159_s2 }
  0x23   :  { %162 = dma.hbm_to_vmem [thread:$0]  %s158_s30, 128, %s160_s2, [#allocation21]  }
  0x24   :  { %1593 = dma.done.wait [#allocation6], 16  }
  0x25   :  { %1594 = vsyncadd [#allocation6], 4294967280 }
  0x26   :  { %1595 = dma.done.wait [#allocation4], 128  }
  0x27   :  { %1596 = vsyncadd [#allocation4], 4294967168 }
  0x28   :  { %1597 = dma.done.wait [#allocation9], 256  }
  0x29   :  { %1598 = vsyncadd [#allocation9], 4294967040 }
  0x2a   :  { %1599 = dma.done.wait [#allocation12], 1040  }
  0x2b   :  { %1600 = vsyncadd [#allocation12], 4294966256 }
  0x2c   :  { %1601 = dma.done.wait [#allocation15], 640  }
  0x2d   :  { %1602 = vsyncadd [#allocation15], 4294966656 }
  0x2e   :  { %1603 = dma.done.wait [#allocation18], 4096  }
  0x2f   :  { %1604 = vsyncadd [#allocation18], 4294963200 }
  0x30   :  { %1605 = dma.done.wait [#allocation21], 128  }
  0x31   :  { %1606 = vsyncadd [#allocation21], 4294967168 }
  0x32   :  { %207 = sfence }
  0x33   :  { %v277_v0 = vld [vmem:[%s1993_s5 + $0x38] sm:$0x7f]  ;;  %vm307_vm0 = vcmask 1046528   ;;  %v276_v2 = vld [vmem:[%s1993_s5 + $0x30] sm:$0xff]  ;;  %v275_v4 = vld [vmem:[%s1993_s5 + $0x28] sm:$0xff]  ;;  %vm279_vm1 = vcmask 261120  }
  0x34   :  { %v221_v1 = vld [vmem:[%s1994_s6 + $0x18] sm:$0xff]  ;;  %1197 = vmatpush.msk.msra.mxu1 %vm307_vm0, %v277_v0  ;;  %v220_v3 = vld [vmem:[%s1994_s6 + $0x10] sm:$0xff]  ;;  %v219_v5 = vld [vmem:[%s1994_s6 + $0x8] sm:$0xff]  ;;  %vm303_vm2 = vcmask 515072   ;;  %s1794_s13 = sld [smem:[#allocation3 + $0x1]]  ;;  %s1625_s4 = smov 32  }
  0x35   :  { %295 = vmatpush.msra.mxu2 %v221_v1  ;;  %v274_v6 = vld [vmem:[%s1993_s5 + $0x20] sm:$0xff]  ;;  %v278_v8 = vld [vmem:[#allocation8] sm:$0xff]  ;;  %v273_v9 = vld [vmem:[%s1993_s5 + $0x18] sm:$0xff]  ;;  %s1805_s18 = sld [smem:[#allocation3]]  ;;  %s1626_s1 = smov 96   ;;  %vm465_vm9 = vcmask 253952  }
  0x36   :  { %320 = vmatpush.msra.mxu1 %v276_v2  ;;  %v218_v7 = vld [vmem:[%s1994_s6] sm:$0xff]  ;;  %v272_v10 = vld [vmem:[%s1993_s5 + $0x10] sm:$0xff]  ;;  %v271_v11 = vld [vmem:[%s1993_s5 + $0x8] sm:$0xff]  ;;  %s1807_s19 = sld [smem:[#allocation3 + $0x2]]  ;;  %s1165_s30 = sshll.u32 %s2003_s15, 4  ;;  %s1166_s30 = int_to_ptr.hbm [resolvable:$true] %s1165_s30 }
  0x37   :  { %296 = vmatpush.msra.mxu2 %v220_v3  ;;  %v270_v12 = vld [vmem:[%s1993_s5] sm:$0xff]  ;;  %v269_v13 = vld [vmem:[#allocation7] sm:$0xff]  ;;  %v1191_v14 = vld [vmem:[%s1994_s6 + $0x38] sm:$0xff]  ;;  %s1628_s12 = smov [#allocation22]   ;;  %s1154_s24 = sshll.u32 %s2002_s14, 4  ;;  %s1155_s24 = int_to_ptr.hbm [resolvable:$true] %s1154_s24 }
  0x38   :  { %321 = vmatpush.msra.mxu1 %v275_v4  ;;  %v1190_v15 = vld [vmem:[%s1994_s6 + $0x30] sm:$0xff]  ;;  %v1189_v16 = vld [vmem:[%s1994_s6 + $0x28] sm:$0xff]  ;;  %v1188_v17 = vld [vmem:[%s1994_s6 + $0x20] sm:$0xff]  ;;  %s1624_s6 = smov 64   ;;  %s1152_s2 = sshll.u32 %s1628_s12, 4  ;;  %s1153_s2 = int_to_ptr.vmem [resolvable:$true] %s1152_s2 }
  0x39   :  { %297 = vmatpush.msra.mxu2 %v219_v5  ;;  %v236_v18 = vld [vmem:[#allocation14] sm:$0x77]  ;;  %v1809_v19 = vld [vmem:[#allocation13 + $0x38] sm:$0xff]  ;;  %v1811_v20 = vld [vmem:[#allocation13 + $0x30] sm:$0xff] }
  0x3a   :  { %322 = vmatpush.msra.mxu1 %v274_v6  ;;  %v254_v21 = vrot.slane %v236_v18, 4  ;;  %v214_v22 = vld [vmem:[#allocation20 + $0x3] sm:$0x1]  ;;  %558 = vmatpush.msra.mxu3 %v1809_v19  ;;  %v239_v23 = vstv %s1794_s13  ;;  %v230_v25 = vld [vmem:[#allocation13 + $0x18] sm:$0xff]  ;;  %v1821_v26 = vld [vmem:[#allocation13 + $0x20] sm:$0xff] }
  0x3b   :  { %298 = vmatpush.msra.mxu2 %v218_v7  ;;  %v1816_v24 = vld [vmem:[#allocation13 + $0x28] sm:$0xff]  ;;  %434 = vrot.lane.b32.xlu0 %v214_v22, %s1624_s6  ;;  %v389_v28 = vld [vmem:[#allocation11] sm:$0x1]  ;;  %v237_v29 = vstv %s1805_s18  ;;  %v229_v46 = vld [vmem:[#allocation13 + $0x10] sm:$0xff] }
  0x3c   :  { %1196 = vmatmul.msk.f32.vlgmr.msra.gmra.mxu2 %vm279_vm1, %v278_v8  ;;  %323 = vmatpush.msra.mxu1 %v273_v9  ;;  %v257_v27 = vmul.f32 %v254_v21, %v239_v23  ;;  %v246_v30 = vstv %s1807_s19  ;;  %v256_v31 = vmul.f32 %v254_v21, %v237_v29  ;;  %v1237_v41 = vld [vmem:[#allocation20] ss:$0 sm:$0xff]  ;;  %v227_v48 = vld [vmem:[#allocation13] sm:$0xff]  ;;  %v1239_v51 = vld [vmem:[#allocation11] ss:$0 sm:$0xff] }
  0x3d   :  { %354 = vmatpush.msrb.mxu2 %v1191_v14  ;;  %635 = vmatpush.msra.mxu0 %v1809_v19  ;;  %v263_v33 = vmul.f32 %v254_v21, %v246_v30  ;;  %v228_v47 = vld [vmem:[#allocation13 + $0x8] sm:$0xff] }
  0x3e   :  { %324 = vmatpush.msra.mxu1 %v272_v10  ;;  %559 = vmatpush.msra.mxu3 %v1811_v20  ;;  %v1194_v32 = vrot.slane %v257_v27, 9  ;;  %v1238_v53 = vld [vmem:[#allocation20 + $0x1] ss:$0 sm:$0xff]  ;;  %v1240_v58 = vld [vmem:[#allocation20 + $0x2] ss:$0 sm:$0xff] }
  0x3f   :  { %355 = vmatpush.msrb.mxu2 %v1190_v15  ;;  %636 = vmatpush.msra.mxu0 %v1811_v20  ;;  %v1195_v35 = vrot.slane %v263_v33, 10 }
  0x40   :  { %325 = vmatpush.msra.mxu1 %v271_v11  ;;  %560 = vmatpush.msra.mxu3 %v1816_v24  ;;  %v262_v34 = vadd.f32 %v1194_v32, %v256_v31 }
  0x41   :  { %356 = vmatpush.msrb.mxu2 %v1189_v16  ;;  %637 = vmatpush.msra.mxu0 %v1816_v24 }
  0x42   :  { %326 = vmatpush.msra.mxu1 %v270_v12  ;;  %561 = vmatpush.msra.mxu3 %v1821_v26  ;;  %v268_v36 = vadd.f32 %v1195_v35, %v262_v34 }
  0x43   :  { %1198 = vmatmul.msk.f32.vlgmr.msra.gmra.mxu1 %vm303_vm2, %v269_v13  ;;  %357 = vmatpush.msrb.mxu2 %v1188_v17 }
  0x44   :  { %405 = vmatpush.msrb.mxu1 %v1809_v19  ;;  %638 = vmatpush.msra.mxu0 %v1821_v26  ;;  %v331_v38 = vperm.slane %v268_v36, 0 }
  0x45   :  { %381 = vmatpush.msra.mxu2 %v230_v25  ;;  %866 = vmatpush.msrb.mxu3 %v1809_v19 }
  0x46   :  { %406 = vmatpush.msrb.mxu1 %v1811_v20  ;;  %943 = vmatpush.msrb.mxu0 %v1809_v19 }
  0x47   :  { %867 = vmatpush.msrb.mxu3 %v1811_v20  ;;  %382 = vmatpush.msra.mxu2 %v229_v46 }
  0x48   :  { %407 = vmatpush.msrb.mxu1 %v1816_v24  ;;  %944 = vmatpush.msrb.mxu0 %v1811_v20 }
  0x49   :  { %868 = vmatpush.msrb.mxu3 %v1816_v24  ;;  %383 = vmatpush.msra.mxu2 %v228_v47 }
  0x4a   :  { %408 = vmatpush.msrb.mxu1 %v1821_v26  ;;  %945 = vmatpush.msrb.mxu0 %v1816_v24 }
  0x4b   :  { %1201 = vmatmul.msk.f32.vlgmr.msrb.gmra.mxu1 %vm279_vm1, %v389_v28  ;;  %869 = vmatpush.msrb.mxu3 %v1821_v26 }
  0x4c   :  { %712 = vmatpush.msra.mxu1 %v1809_v19  ;;  %946 = vmatpush.msrb.mxu0 %v1821_v26 }
  0x4d   :  { %384 = vmatpush.msra.mxu2 %v227_v48  ;;  %456 = vrot.lane.b32.xlu2 %v1239_v51, %s1625_s4 }
  0x4e   :  { %713 = vmatpush.msra.mxu1 %v1811_v20 }
  0x50   :  { %714 = vmatpush.msra.mxu1 %v1816_v24 }
  0x52   :  { %715 = vmatpush.msra.mxu1 %v1821_v26 }
  0xa7   :  { %v457_v16 = vpop.permute.xlu2 %456 }
  0xad   :  { %v1853_v50 = vpop.permute.xlu0 %434 }
  0xbf   :  { %v300_v37 = vpop.f32.mrf.mxu2 }
  0xc0   :  { %v328_v39 = vpop.f32.mrf.mxu1 }
  0xc1   :  { %v329_v40 = vadd.f32 %v328_v39, %v300_v37 }
  0xc3   :  { %v332_v42 = vadd.f32 %v331_v38, %v329_v40 }
  0xc5   :  { %v334_v43 = vadd.f32 %v1237_v41, %v332_v42 }
  0xc7   :  { %vm335_vm3 = vcmp.ge.f32.partialorder %v334_v43, 0.0  ;;  %v336_v44 = vmul.f32 0.2, %v334_v43 }
  0xc8   :  { %v410_v49 = vpop.f32.mrf.mxu1 }
  0xc9   :  { %v337_v45 = vsel %vm335_vm3, %v334_v43, %v336_v44  ;;  %v437_v52 = vadd.f32 %v1853_v50, %v410_v49 }
  0xca   :  { %1199 = vmatmul.msk.f32.vlgmr.msrb.gmra.mxu2 %vm279_vm1, %v337_v45 }
  0xcb   :  { %481 = vmatpush.msrb.mxu2 %v1809_v19  ;;  %439 = vrot.lane.b32.xlu0 %v437_v52, %s1624_s6 }
  0xcd   :  { %482 = vmatpush.msrb.mxu2 %v1811_v20 }
  0xcf   :  { %483 = vmatpush.msrb.mxu2 %v1816_v24 }
  0xd1   :  { %484 = vmatpush.msrb.mxu2 %v1821_v26 }
 0x13d   :  { %v440_v9 = vpop.permute.xlu0 %439 }
 0x14d   :  { %v359_v54 = vpop.f32.mrf.mxu2 }
 0x14e   :  { %v360_v55 = vadd.f32 %v1238_v53, %v359_v54 }
 0x150   :  { %vm362_vm4 = vcmp.ge.f32.partialorder %v360_v55, 0.0  ;;  %v363_v56 = vmul.f32 0.2, %v360_v55 }
 0x152   :  { %v364_v57 = vsel %vm362_vm4, %v360_v55, %v363_v56 }
 0x153   :  { %1200 = vmatmul.msk.f32.vlgmr.msra.gmra.mxu2 %vm279_vm1, %v364_v57 }
 0x154   :  { %789 = vmatpush.msra.mxu2 %v1809_v19 }
 0x156   :  { %790 = vmatpush.msra.mxu2 %v1811_v20 }
 0x158   :  { %791 = vmatpush.msra.mxu2 %v1816_v24 }
 0x15a   :  { %792 = vmatpush.msra.mxu2 %v1821_v26 }
 0x1d6   :  { %v386_v59 = vpop.f32.mrf.mxu2 }
 0x1d7   :  { %v1866_v60 = vadd.f32 %v1240_v58, %v386_v59 }
 0x1d9   :  { %v413_v61 = vadd.f32 %v410_v49, %v1866_v60 }
 0x1db   :  { %v1202_v62 = vmul.f32 -1.442695, %v413_v61 }
 0x1dd   :  { %1244 = vpow2.f32 %v1202_v62 }
 0x1e3   :  { %v1245_v63 = vpop.eup %1244 }
 0x1e4   :  { %v417_v0 = vadd.f32 1.0, %v1245_v63 }
 0x1e6   :  { %1246 = vrcp.f32 %v417_v0  ;;  %v429_v4 = vand.u32 2147483648, %v417_v0  ;;  %v427_v6 = vand.u32 2147483647, %v417_v0  ;;  %vm423_vm6 = vweird.f32 %v417_v0 }
 0x1e8   :  { %v430_v8 = vor.u32 1.1754944e-38, %v429_v4  ;;  %vm428_vm8 = vcmp.eq.f32.partialorder %v427_v6, 8.507059e+37 }
 0x1ec   :  { %v1247_v1 = vpop.eup %1246 }
 0x1ed   :  { %v419_v2 = vmul.f32 %v1247_v1, %v417_v0  ;;  %vm424_vm5 = vweird.f32 %v1247_v1 }
 0x1ee   :  { %vm425_vm7 = vmor %vm423_vm6, %vm424_vm5 }
 0x1ef   :  { %v420_v3 = vsub.f32 1.0, %v419_v2 }
 0x1f1   :  { %v421_v5 = vmul.f32 %v1247_v1, %v420_v3 }
 0x1f3   :  { %v422_v7 = vadd.f32 %v1247_v1, %v421_v5 }
 0x1f5   :  { %v426_v10 = vsel %vm425_vm7, %v1247_v1, %v422_v7 }
 0x1f6   :  { %v431_v11 = vsel %vm428_vm8, %v430_v8, %v426_v10 }
 0x1f7   :  { %v442_v12 = vmul.f32 %v440_v9, %v431_v11  ;;  %v449_v17 = vsub.f32 1.0, %v431_v11  ;;  %v459_v19 = vmul.f32 %v457_v16, %v431_v11 }
 0x1f9   :  { %444 = vrot.lane.b32.xlu1 %v442_v12, %s1624_s6 }
 0x26b   :  { %v445_v13 = vpop.permute.xlu1 %444 }
 0x26c   :  { %v447_v14 = vadd.f32 %v445_v13, %v1866_v60 }
 0x26e   :  { %1248 = vtanh.f32 %v447_v14 }
 0x274   :  { %v1249_v15 = vpop.eup %1248 }
 0x275   :  { %451 = vrot.lane.b32.xlu1 %v1249_v15, %s1626_s1 }
 0x2e7   :  { %v452_v18 = vpop.permute.xlu1 %451 }
 0x2e8   :  { %v454_v20 = vmul.f32 %v452_v18, %v449_v17 }
 0x2ea   :  { %v460_v21 = vadd.f32 %v459_v19, %v454_v20 }
 0x2ec   :  { %462 = vrot.lane.b32.xlu2 %v460_v21, %s1626_s1  ;;  %v531_v49 = vrot.slane %v460_v21, 7 }
 0x346   :  { %v463_v22 = vpop.permute.xlu2 %462 }
 0x347   :  { %466 = vst.msk [vmem:[#allocation2] sm:$0x1] %vm465_vm9, %v463_v22  ;;  %1203 = vmatmul.msk.f32.vlgmr.msrb.gmra.mxu2 %vm279_vm1, %v463_v22 }
 0x3ca   :  { %v486_v24 = vpop.f32.mrf.mxu2 }
 0x3cb   :  { %v512_v25 = vadd.f32 %v486_v24, %v1853_v50  ;;  %v490_v27 = vrot.slane %v486_v24, 7 }
 0x3cd   :  { %v514_v26 = vrot.slane %v512_v25, 7  ;;  %v492_v28 = vadd.f32 %v490_v27, %v1866_v60 }
 0x3cf   :  { %515 = vrot.lane.b32.xlu0 %v514_v26, %s1624_s6  ;;  %v1204_v31 = vmul.f32 -1.442695, %v492_v28 }
 0x3d1   :  { %1250 = vpow2.f32 %v1204_v31 }
 0x3d7   :  { %v1251_v32 = vpop.eup %1250 }
 0x3d8   :  { %v496_v33 = vadd.f32 1.0, %v1251_v32 }
 0x3da   :  { %1252 = vrcp.f32 %v496_v33  ;;  %v508_v39 = vand.u32 2147483648, %v496_v33  ;;  %vm502_vm11 = vweird.f32 %v496_v33  ;;  %v506_v40 = vand.u32 2147483647, %v496_v33 }
 0x3dc   :  { %v509_v42 = vor.u32 1.1754944e-38, %v508_v39  ;;  %vm507_vm13 = vcmp.eq.f32.partialorder %v506_v40, 8.507059e+37 }
 0x3e0   :  { %v1253_v34 = vpop.eup %1252 }
 0x3e1   :  { %v498_v35 = vmul.f32 %v1253_v34, %v496_v33  ;;  %vm503_vm10 = vweird.f32 %v1253_v34 }
 0x3e2   :  { %vm504_vm12 = vmor %vm502_vm11, %vm503_vm10 }
 0x3e3   :  { %v499_v36 = vsub.f32 1.0, %v498_v35 }
 0x3e5   :  { %v500_v37 = vmul.f32 %v1253_v34, %v499_v36 }
 0x3e7   :  { %v501_v38 = vadd.f32 %v1253_v34, %v500_v37 }
 0x3e9   :  { %v505_v41 = vsel %vm504_vm12, %v1253_v34, %v501_v38 }
 0x3ea   :  { %v510_v44 = vsel %vm507_vm13, %v509_v42, %v505_v41 }
 0x3eb   :  { %v525_v51 = vsub.f32 1.0, %v510_v44  ;;  %v533_v54 = vmul.f32 %v531_v49, %v510_v44 }
 0x441   :  { %v516_v43 = vpop.permute.xlu0 %515 }
 0x442   :  { %v518_v45 = vmul.f32 %v516_v43, %v510_v44 }
 0x444   :  { %520 = vrot.lane.b32.xlu1 %v518_v45, %s1624_s6 }
 0x4b6   :  { %v521_v46 = vpop.permute.xlu1 %520 }
 0x4b7   :  { %v523_v47 = vadd.f32 %v521_v46, %v1866_v60 }
 0x4b9   :  { %1254 = vtanh.f32 %v523_v47 }
 0x4bf   :  { %v1255_v48 = vpop.eup %1254 }
 0x4c0   :  { %527 = vrot.lane.b32.xlu2 %v1255_v48, %s1626_s1 }
 0x51a   :  { %v528_v52 = vpop.permute.xlu2 %527 }
 0x51b   :  { %v530_v53 = vmul.f32 %v528_v52, %v525_v51 }
 0x51d   :  { %v1880_v55 = vadd.f32 %v533_v54, %v530_v53 }
 0x51f   :  { %v541_v56 = vrot.slane %v1880_v55, 1  ;;  %v608_v19 = vrot.slane %v1880_v55, 7 }
 0x521   :  { %542 = vrot.lane.b32.xlu0 %v541_v56, %s1626_s1 }
 0x593   :  { %v543_v57 = vpop.permute.xlu0 %542 }
 0x594   :  { %1205 = vmatmul.msk.f32.vlgmr.msra.gmra.mxu3 %vm279_vm1, %v543_v57 }
 0x617   :  { %v563_v58 = vpop.f32.mrf.mxu3 }
 0x618   :  { %v589_v59 = vadd.f32 %v563_v58, %v1853_v50  ;;  %v567_v62 = vrot.slane %v563_v58, 6 }
 0x61a   :  { %v591_v61 = vrot.slane %v589_v59, 6  ;;  %v569_v63 = vadd.f32 %v567_v62, %v1866_v60 }
 0x61c   :  { %592 = vrot.lane.b32.xlu1 %v591_v61, %s1624_s6  ;;  %v1206_v0 = vmul.f32 -1.442695, %v569_v63 }
 0x61e   :  { %1256 = vpow2.f32 %v1206_v0 }
 0x624   :  { %v1257_v1 = vpop.eup %1256 }
 0x625   :  { %v573_v2 = vadd.f32 1.0, %v1257_v1 }
 0x627   :  { %1258 = vrcp.f32 %v573_v2  ;;  %v585_v8 = vand.u32 2147483648, %v573_v2  ;;  %vm579_vm15 = vweird.f32 %v573_v2  ;;  %v583_v9 = vand.u32 2147483647, %v573_v2 }
 0x629   :  { %v586_v11 = vor.u32 1.1754944e-38, %v585_v8  ;;  %vm584_vm2 = vcmp.eq.f32.partialorder %v583_v9, 8.507059e+37 }
 0x62d   :  { %v1259_v3 = vpop.eup %1258 }
 0x62e   :  { %v575_v4 = vmul.f32 %v1259_v3, %v573_v2  ;;  %vm580_vm14 = vweird.f32 %v1259_v3 }
 0x62f   :  { %vm581_vm0 = vmor %vm579_vm15, %vm580_vm14 }
 0x630   :  { %v576_v5 = vsub.f32 1.0, %v575_v4 }
 0x632   :  { %v577_v6 = vmul.f32 %v1259_v3, %v576_v5 }
 0x634   :  { %v578_v7 = vadd.f32 %v1259_v3, %v577_v6 }
 0x636   :  { %v582_v10 = vsel %vm581_vm0, %v1259_v3, %v578_v7 }
 0x637   :  { %v587_v13 = vsel %vm584_vm2, %v586_v11, %v582_v10 }
 0x638   :  { %v602_v18 = vsub.f32 1.0, %v587_v13  ;;  %v610_v21 = vmul.f32 %v608_v19, %v587_v13 }
 0x68e   :  { %v593_v12 = vpop.permute.xlu1 %592 }
 0x68f   :  { %v595_v14 = vmul.f32 %v593_v12, %v587_v13 }
 0x691   :  { %597 = vrot.lane.b32.xlu2 %v595_v14, %s1624_s6 }
 0x6eb   :  { %v598_v15 = vpop.permute.xlu2 %597 }
 0x6ec   :  { %v600_v16 = vadd.f32 %v598_v15, %v1866_v60 }
 0x6ee   :  { %1260 = vtanh.f32 %v600_v16 }
 0x6f4   :  { %v1261_v17 = vpop.eup %1260 }
 0x6f5   :  { %604 = vrot.lane.b32.xlu0 %v1261_v17, %s1626_s1 }
 0x767   :  { %v605_v20 = vpop.permute.xlu0 %604 }
 0x768   :  { %v607_v22 = vmul.f32 %v605_v20, %v602_v18 }
 0x76a   :  { %v1892_v24 = vadd.f32 %v610_v21, %v607_v22 }
 0x76c   :  { %v618_v25 = vrot.slane %v1892_v24, 2  ;;  %v685_v54 = vrot.slane %v1892_v24, 7 }
 0x76e   :  { %619 = vrot.lane.b32.xlu1 %v618_v25, %s1626_s1 }
 0x7e0   :  { %v620_v26 = vpop.permute.xlu1 %619 }
 0x7e1   :  { %1207 = vmatmul.msk.f32.vlgmr.msra.gmra.mxu0 %vm279_vm1, %v620_v26 }
 0x85e   :  { %v640_v27 = vpop.f32.mrf.mxu0 }
 0x85f   :  { %v666_v28 = vadd.f32 %v640_v27, %v1853_v50  ;;  %v644_v32 = vrot.slane %v640_v27, 5 }
 0x861   :  { %v668_v31 = vrot.slane %v666_v28, 5  ;;  %v646_v33 = vadd.f32 %v644_v32, %v1866_v60 }
 0x863   :  { %669 = vrot.lane.b32.xlu2 %v668_v31, %s1624_s6  ;;  %v1208_v34 = vmul.f32 -1.442695, %v646_v33 }
 0x865   :  { %1262 = vpow2.f32 %v1208_v34 }
 0x86b   :  { %v1263_v35 = vpop.eup %1262 }
 0x86c   :  { %v650_v36 = vadd.f32 1.0, %v1263_v35 }
 0x86e   :  { %1264 = vrcp.f32 %v650_v36  ;;  %v662_v42 = vand.u32 2147483648, %v650_v36  ;;  %vm656_vm4 = vweird.f32 %v650_v36  ;;  %v660_v43 = vand.u32 2147483647, %v650_v36 }
 0x870   :  { %v663_v45 = vor.u32 1.1754944e-38, %v662_v42  ;;  %vm661_vm6 = vcmp.eq.f32.partialorder %v660_v43, 8.507059e+37 }
 0x874   :  { %v1265_v37 = vpop.eup %1264 }
 0x875   :  { %v652_v38 = vmul.f32 %v1265_v37, %v650_v36  ;;  %vm657_vm3 = vweird.f32 %v1265_v37 }
 0x876   :  { %vm658_vm5 = vmor %vm656_vm4, %vm657_vm3 }
 0x877   :  { %v653_v39 = vsub.f32 1.0, %v652_v38 }
 0x879   :  { %v654_v40 = vmul.f32 %v1265_v37, %v653_v39 }
 0x87b   :  { %v655_v41 = vadd.f32 %v1265_v37, %v654_v40 }
 0x87d   :  { %v659_v44 = vsel %vm658_vm5, %v1265_v37, %v655_v41 }
 0x87e   :  { %v664_v47 = vsel %vm661_vm6, %v663_v45, %v659_v44 }
 0x87f   :  { %v679_v53 = vsub.f32 1.0, %v664_v47  ;;  %v687_v57 = vmul.f32 %v685_v54, %v664_v47 }
 0x8bd   :  { %v670_v46 = vpop.permute.xlu2 %669 }
 0x8be   :  { %v672_v48 = vmul.f32 %v670_v46, %v664_v47 }
 0x8c0   :  { %674 = vrot.lane.b32.xlu0 %v672_v48, %s1624_s6 }
 0x932   :  { %v675_v49 = vpop.permute.xlu0 %674 }
 0x933   :  { %v677_v51 = vadd.f32 %v675_v49, %v1866_v60 }
 0x935   :  { %1266 = vtanh.f32 %v677_v51 }
 0x93b   :  { %v1267_v52 = vpop.eup %1266 }
 0x93c   :  { %681 = vrot.lane.b32.xlu1 %v1267_v52, %s1626_s1 }
 0x9ae   :  { %v682_v56 = vpop.permute.xlu1 %681 }
 0x9af   :  { %v684_v58 = vmul.f32 %v682_v56, %v679_v53 }
 0x9b1   :  { %v1904_v59 = vadd.f32 %v687_v57, %v684_v58 }
 0x9b3   :  { %v695_v61 = vrot.slane %v1904_v59, 3  ;;  %v762_v25 = vrot.slane %v1904_v59, 7 }
 0x9b5   :  { %696 = vrot.lane.b32.xlu2 %v695_v61, %s1626_s1 }
 0xa0f   :  { %v697_v62 = vpop.permute.xlu2 %696 }
 0xa10   :  { %1209 = vmatmul.msk.f32.vlgmr.msra.gmra.mxu1 %vm279_vm1, %v697_v62 }
 0xa8d   :  { %v717_v63 = vpop.f32.mrf.mxu1 }
 0xa8e   :  { %v743_v0 = vadd.f32 %v717_v63, %v1853_v50  ;;  %v721_v2 = vrot.slane %v717_v63, 4 }
 0xa90   :  { %v745_v1 = vrot.slane %v743_v0, 4  ;;  %v723_v3 = vadd.f32 %v721_v2, %v1866_v60 }
 0xa92   :  { %746 = vrot.lane.b32.xlu0 %v745_v1, %s1624_s6  ;;  %v1210_v4 = vmul.f32 -1.442695, %v723_v3 }
 0xa94   :  { %1268 = vpow2.f32 %v1210_v4 }
 0xa9a   :  { %v1269_v5 = vpop.eup %1268 }
 0xa9b   :  { %v727_v6 = vadd.f32 1.0, %v1269_v5 }
 0xa9d   :  { %1270 = vrcp.f32 %v727_v6  ;;  %v739_v12 = vand.u32 2147483648, %v727_v6  ;;  %vm733_vm8 = vweird.f32 %v727_v6  ;;  %v737_v13 = vand.u32 2147483647, %v727_v6 }
 0xa9f   :  { %v740_v15 = vor.u32 1.1754944e-38, %v739_v12  ;;  %vm738_vm10 = vcmp.eq.f32.partialorder %v737_v13, 8.507059e+37 }
 0xaa3   :  { %v1271_v7 = vpop.eup %1270 }
 0xaa4   :  { %v729_v8 = vmul.f32 %v1271_v7, %v727_v6  ;;  %vm734_vm7 = vweird.f32 %v1271_v7 }
 0xaa5   :  { %vm735_vm9 = vmor %vm733_vm8, %vm734_vm7  ;;  %vm539_vm8 = vcmask 254977  }
 0xaa6   :  { %v730_v9 = vsub.f32 1.0, %v729_v8 }
 0xaa8   :  { %v731_v10 = vmul.f32 %v1271_v7, %v730_v9 }
 0xaaa   :  { %v732_v11 = vadd.f32 %v1271_v7, %v731_v10 }
 0xaac   :  { %v736_v14 = vsel %vm735_vm9, %v1271_v7, %v732_v11  ;;  %vm770_vm9 = vcmask 258052  }
 0xaad   :  { %v741_v17 = vsel %vm738_vm10, %v740_v15, %v736_v14  ;;  %vm616_vm10 = vcmask 256002  }
 0xaae   :  { %v756_v22 = vsub.f32 1.0, %v741_v17  ;;  %v764_v27 = vmul.f32 %v762_v25, %v741_v17 }
 0xb04   :  { %v747_v16 = vpop.permute.xlu0 %746 }
 0xb05   :  { %v749_v18 = vmul.f32 %v747_v16, %v741_v17 }
 0xb07   :  { %751 = vrot.lane.b32.xlu1 %v749_v18, %s1624_s6 }
 0xb79   :  { %v752_v19 = vpop.permute.xlu1 %751 }
 0xb7a   :  { %v754_v20 = vadd.f32 %v752_v19, %v1866_v60 }
 0xb7c   :  { %1272 = vtanh.f32 %v754_v20 }
 0xb82   :  { %v1273_v21 = vpop.eup %1272 }
 0xb83   :  { %758 = vrot.lane.b32.xlu2 %v1273_v21, %s1626_s1 }
 0xbdd   :  { %v759_v26 = vpop.permute.xlu2 %758 }
 0xbde   :  { %v761_v28 = vmul.f32 %v759_v26, %v756_v22 }
 0xbe0   :  { %v1916_v31 = vadd.f32 %v764_v27, %v761_v28 }
 0xbe2   :  { %v772_v32 = vrot.slane %v1916_v31, 4  ;;  %v839_v62 = vrot.slane %v1916_v31, 7 }
 0xbe4   :  { %773 = vrot.lane.b32.xlu0 %v772_v32, %s1626_s1 }
 0xc56   :  { %v774_v33 = vpop.permute.xlu0 %773 }
 0xc57   :  { %1211 = vmatmul.msk.f32.vlgmr.msra.gmra.mxu2 %vm279_vm1, %v774_v33 }
 0xcda   :  { %v794_v34 = vpop.f32.mrf.mxu2 }
 0xcdb   :  { %v820_v35 = vadd.f32 %v794_v34, %v1853_v50  ;;  %v798_v37 = vrot.slane %v794_v34, 3 }
 0xcdd   :  { %v822_v36 = vrot.slane %v820_v35, 3  ;;  %v800_v38 = vadd.f32 %v798_v37, %v1866_v60 }
 0xcdf   :  { %823 = vrot.lane.b32.xlu1 %v822_v36, %s1624_s6  ;;  %v1212_v39 = vmul.f32 -1.442695, %v800_v38 }
 0xce1   :  { %1274 = vpow2.f32 %v1212_v39 }
 0xce7   :  { %v1275_v40 = vpop.eup %1274 }
 0xce8   :  { %v804_v41 = vadd.f32 1.0, %v1275_v40 }
 0xcea   :  { %1276 = vrcp.f32 %v804_v41  ;;  %v816_v47 = vand.u32 2147483648, %v804_v41  ;;  %vm810_vm12 = vweird.f32 %v804_v41  ;;  %v814_v48 = vand.u32 2147483647, %v804_v41 }
 0xcec   :  { %v817_v51 = vor.u32 1.1754944e-38, %v816_v47  ;;  %vm815_vm14 = vcmp.eq.f32.partialorder %v814_v48, 8.507059e+37 }
 0xcf0   :  { %v1277_v42 = vpop.eup %1276 }
 0xcf1   :  { %v806_v43 = vmul.f32 %v1277_v42, %v804_v41  ;;  %vm811_vm11 = vweird.f32 %v1277_v42 }
 0xcf2   :  { %vm812_vm13 = vmor %vm810_vm12, %vm811_vm11  ;;  %vm847_vm11 = vcmask 259077   ;;  %vm693_vm12 = vcmask 257027  }
 0xcf3   :  { %v807_v44 = vsub.f32 1.0, %v806_v43 }
 0xcf5   :  { %v808_v45 = vmul.f32 %v1277_v42, %v807_v44 }
 0xcf7   :  { %v809_v46 = vadd.f32 %v1277_v42, %v808_v45 }
 0xcf9   :  { %v813_v49 = vsel %vm812_vm13, %v1277_v42, %v809_v46  ;;  %vm924_vm13 = vcmask 260102  }
 0xcfa   :  { %v818_v53 = vsel %vm815_vm14, %v817_v51, %v813_v49  ;;  %vm1015_vm14 = vcmask 326656  }
 0xcfb   :  { %v833_v61 = vsub.f32 1.0, %v818_v53  ;;  %v841_v0 = vmul.f32 %v839_v62, %v818_v53 }
 0xd51   :  { %v824_v52 = vpop.permute.xlu1 %823 }
 0xd52   :  { %v826_v54 = vmul.f32 %v824_v52, %v818_v53 }
 0xd54   :  { %828 = vrot.lane.b32.xlu2 %v826_v54, %s1624_s6 }
 0xdae   :  { %v829_v56 = vpop.permute.xlu2 %828 }
 0xdaf   :  { %v831_v57 = vadd.f32 %v829_v56, %v1866_v60 }
 0xdb1   :  { %1278 = vtanh.f32 %v831_v57 }
 0xdb7   :  { %v1279_v58 = vpop.eup %1278 }
 0xdb8   :  { %835 = vrot.lane.b32.xlu0 %v1279_v58, %s1626_s1 }
 0xe2a   :  { %v836_v63 = vpop.permute.xlu0 %835 }
 0xe2b   :  { %v838_v1 = vmul.f32 %v836_v63, %v833_v61 }
 0xe2d   :  { %v1928_v2 = vadd.f32 %v841_v0, %v838_v1 }
 0xe2f   :  { %v849_v3 = vrot.slane %v1928_v2, 5  ;;  %v916_v34 = vrot.slane %v1928_v2, 7 }
 0xe31   :  { %850 = vrot.lane.b32.xlu1 %v849_v3, %s1626_s1 }
 0xea3   :  { %v851_v4 = vpop.permute.xlu1 %850 }
 0xea4   :  { %1213 = vmatmul.msk.f32.vlgmr.msrb.gmra.mxu3 %vm279_vm1, %v851_v4 }
 0xf27   :  { %v871_v5 = vpop.f32.mrf.mxu3 }
 0xf28   :  { %v897_v6 = vadd.f32 %v871_v5, %v1853_v50  ;;  %v875_v8 = vrot.slane %v871_v5, 2 }
 0xf2a   :  { %v899_v7 = vrot.slane %v897_v6, 2  ;;  %v877_v9 = vadd.f32 %v875_v8, %v1866_v60 }
 0xf2c   :  { %900 = vrot.lane.b32.xlu2 %v899_v7, %s1624_s6  ;;  %v1214_v10 = vmul.f32 -1.442695, %v877_v9 }
 0xf2e   :  { %1280 = vpow2.f32 %v1214_v10 }
 0xf34   :  { %v1281_v11 = vpop.eup %1280 }
 0xf35   :  { %v881_v12 = vadd.f32 1.0, %v1281_v11  ;;  %v1009_v11 = vld [vmem:[#allocation16 + $0x18] sm:$0xff] }
 0xf36   :  { %1054 = vmatpush.msrb.mxu2 %v1009_v11 }
 0xf37   :  { %1282 = vrcp.f32 %v881_v12  ;;  %v893_v18 = vand.u32 2147483648, %v881_v12  ;;  %vm887_vm0 = vweird.f32 %v881_v12  ;;  %v891_v19 = vand.u32 2147483647, %v881_v12 }
 0xf39   :  { %v894_v21 = vor.u32 1.1754944e-38, %v893_v18  ;;  %vm892_vm3 = vcmp.eq.f32.partialorder %v891_v19, 8.507059e+37  ;;  %v1084_v18 = vld [vmem:[#allocation17 + $0x78] sm:$0xff]  ;;  %v1083_v19 = vld [vmem:[#allocation17 + $0x70] sm:$0xff] }
 0xf3a   :  { %1086 = vmatpush.msra.mxu3 %v1084_v18 }
 0xf3c   :  { %1087 = vmatpush.msra.mxu3 %v1083_v19 }
 0xf3d   :  { %v1283_v13 = vpop.eup %1282 }
 0xf3e   :  { %v883_v14 = vmul.f32 %v1283_v13, %v881_v12  ;;  %vm888_vm15 = vweird.f32 %v1283_v13  ;;  %v1008_v12 = vld [vmem:[#allocation16 + $0x10] sm:$0xff] }
 0xf3f   :  { %vm889_vm2 = vmor %vm887_vm0, %vm888_vm15  ;;  %1055 = vmatpush.msrb.mxu2 %v1008_v12  ;;  %vm1001_vm15 = vcmask 261127  }
 0xf40   :  { %v884_v15 = vsub.f32 1.0, %v883_v14  ;;  %v1007_v14 = vld [vmem:[#allocation16 + $0x8] sm:$0xff] }
 0xf41   :  { %1056 = vmatpush.msrb.mxu2 %v1007_v14 }
 0xf42   :  { %v885_v16 = vmul.f32 %v1283_v13, %v884_v15  ;;  %v1006_v15 = vld [vmem:[#allocation16] sm:$0xff] }
 0xf43   :  { %1057 = vmatpush.msrb.mxu2 %v1006_v15 }
 0xf44   :  { %v886_v17 = vadd.f32 %v1283_v13, %v885_v16  ;;  %v1012_v16 = vld [vmem:[%s1998_s10 + $0x10] sm:$0xff] }
 0xf46   :  { %v890_v20 = vsel %vm889_vm2, %v1283_v13, %v886_v17  ;;  %v1013_v13 = vld [vmem:[%s1998_s10 + $0x18] sm:$0xff]  ;;  %v1011_v17 = vld [vmem:[%s1998_s10 + $0x8] sm:$0xff] }
 0xf47   :  { %v895_v25 = vsel %vm892_vm3, %v894_v21, %v890_v20  ;;  %v1010_v20 = vld [vmem:[%s1998_s10] sm:$0xff]  ;;  %v1005_v21 = vld [vmem:[#allocation10] sm:$0xff] }
 0xf48   :  { %v910_v33 = vsub.f32 1.0, %v895_v25  ;;  %v918_v36 = vmul.f32 %v916_v34, %v895_v25  ;;  %v1075_v34 = vld [vmem:[#allocation17 + $0x30] sm:$0xff] }
 0xf86   :  { %v901_v22 = vpop.permute.xlu2 %900 }
 0xf87   :  { %v903_v26 = vmul.f32 %v901_v22, %v895_v25  ;;  %v1082_v22 = vld [vmem:[#allocation17 + $0x68] sm:$0xff]  ;;  %v1081_v25 = vld [vmem:[#allocation17 + $0x60] sm:$0xff] }
 0xf88   :  { %1088 = vmatpush.msra.mxu3 %v1082_v22 }
 0xf89   :  { %905 = vrot.lane.b32.xlu0 %v903_v26, %s1624_s6  ;;  %v1080_v26 = vld [vmem:[#allocation17 + $0x58] sm:$0xff] }
 0xf8a   :  { %1089 = vmatpush.msra.mxu3 %v1081_v25 }
 0xf8c   :  { %1090 = vmatpush.msra.mxu3 %v1080_v26 }
 0xffb   :  { %v906_v27 = vpop.permute.xlu0 %905 }
 0xffc   :  { %v908_v28 = vadd.f32 %v906_v27, %v1866_v60  ;;  %v1079_v27 = vld [vmem:[#allocation17 + $0x50] sm:$0xff] }
 0xffd   :  { %1091 = vmatpush.msra.mxu3 %v1079_v27 }
 0xffe   :  { %1284 = vtanh.f32 %v908_v28  ;;  %v1078_v28 = vld [vmem:[#allocation17 + $0x48] sm:$0xff] }
 0xfff   :  { %1092 = vmatpush.msra.mxu3 %v1078_v28 }
0x1004   :  { %v1285_v32 = vpop.eup %1284 }
0x1005   :  { %912 = vrot.lane.b32.xlu1 %v1285_v32, %s1626_s1  ;;  %v1077_v32 = vld [vmem:[#allocation17 + $0x40] sm:$0xff] }
0x1006   :  { %1093 = vmatpush.msra.mxu3 %v1077_v32 }
0x1077   :  { %v913_v35 = vpop.permute.xlu1 %912 }
0x1078   :  { %v915_v37 = vmul.f32 %v913_v35, %v910_v33  ;;  %v1076_v33 = vld [vmem:[#allocation17 + $0x38] sm:$0xff]  ;;  %v1074_v35 = vld [vmem:[#allocation17 + $0x28] sm:$0xff] }
0x1079   :  { %1094 = vmatpush.msra.mxu3 %v1076_v33 }
0x107a   :  { %v919_v38 = vadd.f32 %v918_v36, %v915_v37 }
0x107b   :  { %1095 = vmatpush.msra.mxu3 %v1075_v34 }
0x107c   :  { %v926_v39 = vrot.slane %v919_v38, 6 }
0x107d   :  { %1096 = vmatpush.msra.mxu3 %v1074_v35 }
0x107e   :  { %927 = vrot.lane.b32.xlu2 %v926_v39, %s1626_s1  ;;  %v1072_v39 = vld [vmem:[#allocation17 + $0x18] sm:$0xff] }
0x10d8   :  { %v928_v40 = vpop.permute.xlu2 %927 }
0x10d9   :  { %1215 = vmatmul.msk.f32.vlgmr.msrb.gmra.mxu0 %vm279_vm1, %v928_v40  ;;  %v1071_v40 = vld [vmem:[#allocation17 + $0x10] sm:$0xff] }
0x1156   :  { %v948_v41 = vpop.f32.mrf.mxu0 }
0x1157   :  { %v974_v42 = vadd.f32 %v948_v41, %v1853_v50  ;;  %v952_v44 = vrot.slane %v948_v41, 1  ;;  %v1070_v41 = vld [vmem:[#allocation17 + $0x8] sm:$0xff] }
0x1159   :  { %v976_v43 = vrot.slane %v974_v42, 1  ;;  %v954_v45 = vadd.f32 %v952_v44, %v1866_v60  ;;  %v1069_v42 = vld [vmem:[#allocation17] sm:$0xff]  ;;  %v1123_v44 = vld [vmem:[#allocation19 + $0x70] sm:$0xff] }
0x115b   :  { %977 = vrot.lane.b32.xlu0 %v976_v43, %s1624_s6  ;;  %v1216_v46 = vmul.f32 -1.442695, %v954_v45  ;;  %v1124_v43 = vld [vmem:[#allocation19 + $0x78] sm:$0xff]  ;;  %v1122_v45 = vld [vmem:[#allocation19 + $0x68] sm:$0xff] }
0x115c   :  { %1126 = vmatpush.msra.mxu0 %v1124_v43 }
0x115d   :  { %1286 = vpow2.f32 %v1216_v46  ;;  %v1121_v46 = vld [vmem:[#allocation19 + $0x60] sm:$0xff] }
0x115e   :  { %1127 = vmatpush.msra.mxu0 %v1123_v44 }
0x1160   :  { %1128 = vmatpush.msra.mxu0 %v1122_v45 }
0x1162   :  { %1129 = vmatpush.msra.mxu0 %v1121_v46 }
0x1163   :  { %536 = vrot.lane.b32.xlu0 %v1880_v55, %s1626_s1  ;;  %v1287_v47 = vpop.eup %1286 }
0x1164   :  { %v958_v48 = vadd.f32 1.0, %v1287_v47  ;;  %v1292_v47 = vld [vmem:[#allocation14] sm:$0x77] }
0x1166   :  { %1288 = vrcp.f32 %v958_v48  ;;  %v970_v54 = vand.u32 2147483648, %v958_v48  ;;  %vm964_vm5 = vweird.f32 %v958_v48  ;;  %v968_v55 = vand.u32 2147483647, %v958_v48 }
0x1168   :  { %vm969_vm7 = vcmp.eq.f32.partialorder %v968_v55, 8.507059e+37  ;;  %v1117_v55 = vld [vmem:[#allocation19 + $0x40] sm:$0xff] }
0x116b   :  { %767 = vrot.lane.b32.xlu0 %v1916_v31, %s1626_s1  ;;  %v971_v31 = vor.u32 1.1754944e-38, %v970_v54  ;;  %v1118_v54 = vld [vmem:[#allocation19 + $0x48] sm:$0xff] }
0x116c   :  { %v1289_v49 = vpop.eup %1288 }
0x116d   :  { %v960_v51 = vmul.f32 %v1289_v49, %v958_v48  ;;  %vm965_vm4 = vweird.f32 %v1289_v49  ;;  %v240_v48 = vmul.f32 %v1292_v47, %v239_v23 }
0x116e   :  { %vm966_vm6 = vmor %vm964_vm5, %vm965_vm4 }
0x116f   :  { %v961_v50 = vsub.f32 1.0, %v960_v51  ;;  %v1119_v51 = vld [vmem:[#allocation19 + $0x50] sm:$0xff] }
0x1171   :  { %v962_v52 = vmul.f32 %v1289_v49, %v961_v50  ;;  %v238_v50 = vmul.f32 %v1292_v47, %v237_v29 }
0x1173   :  { %v963_v53 = vadd.f32 %v1289_v49, %v962_v52  ;;  %v1192_v52 = vrot.slane %v240_v48, 9 }
0x1175   :  { %v967_v56 = vsel %vm966_vm6, %v1289_v49, %v963_v53  ;;  %v1120_v49 = vld [vmem:[#allocation19 + $0x58] sm:$0xff]  ;;  %v247_v53 = vmul.f32 %v1292_v47, %v246_v30 }
0x1176   :  { %v972_v58 = vsel %vm969_vm7, %v971_v31, %v967_v56  ;;  %1130 = vmatpush.msra.mxu0 %v1120_v49  ;;  %v245_v56 = vadd.f32 %v1192_v52, %v238_v50  ;;  %v1112_v30 = vld [vmem:[#allocation19 + $0x18] sm:$0xff] }
0x1177   :  { %v1193_v31 = vrot.slane %v247_v53, 10 }
0x1178   :  { %1131 = vmatpush.msra.mxu0 %v1119_v51 }
0x1179   :  { %v252_v23 = vadd.f32 %v1193_v31, %v245_v56 }
0x117a   :  { %1132 = vmatpush.msra.mxu0 %v1118_v54 }
0x117b   :  { %v1062_v29 = vperm.slane %v252_v23, 0 }
0x117c   :  { %1133 = vmatpush.msra.mxu0 %v1117_v55 }
0x11cd   :  { %v978_v57 = vpop.permute.xlu0 %977 }
0x11ce   :  { %v980_v61 = vmul.f32 %v978_v57, %v972_v58  ;;  %v1116_v57 = vld [vmem:[#allocation19 + $0x38] sm:$0xff] }
0x11cf   :  { %1134 = vmatpush.msra.mxu0 %v1116_v57 }
0x11d0   :  { %982 = vrot.lane.b32.xlu1 %v980_v61, %s1624_s6  ;;  %v1114_v61 = vld [vmem:[#allocation19 + $0x28] sm:$0xff] }
0x11d5   :  { %v537_v62 = vpop.permute.xlu0 %536 }
0x11d6   :  { %540 = vst.msk [vmem:[#allocation2] sm:$0x2] %vm539_vm8, %v537_v62 }
0x11d8   :  { %613 = vrot.lane.b32.xlu1 %v1892_v24, %s1626_s1  ;;  %v987_v24 = vsub.f32 1.0, %v972_v58 }
0x11dd   :  { %v768_v63 = vpop.permute.xlu0 %767 }
0x11de   :  { %771 = vst.msk [vmem:[#allocation2] sm:$0x10] %vm770_vm9, %v768_v63  ;;  %v1113_v63 = vld [vmem:[#allocation19 + $0x20] sm:$0xff] }
0x11e0   :  { %844 = vrot.lane.b32.xlu1 %v1928_v2, %s1626_s1  ;;  %v993_v2 = vrot.slane %v919_v38, 7 }
0x11e2   :  { %v995_v7 = vmul.f32 %v993_v2, %v972_v58  ;;  %v1115_v58 = vld [vmem:[#allocation19 + $0x30] sm:$0xff] }
0x11e3   :  { %1135 = vmatpush.msra.mxu0 %v1115_v58 }
0x11e5   :  { %1136 = vmatpush.msra.mxu0 %v1114_v61 }
0x11e7   :  { %1137 = vmatpush.msra.mxu0 %v1113_v63 }
0x11e9   :  { %1138 = vmatpush.msra.mxu0 %v1112_v30 }
0x1242   :  { %v983_v0 = vpop.permute.xlu1 %982 }
0x1243   :  { %v985_v1 = vadd.f32 %v983_v0, %v1866_v60 }
0x1245   :  { %1290 = vtanh.f32 %v985_v1 }
0x124a   :  { %v614_v3 = vpop.permute.xlu1 %613 }
0x124b   :  { %v1291_v4 = vpop.eup %1290  ;;  %617 = vst.msk [vmem:[#allocation2] sm:$0x4] %vm616_vm10, %v614_v3  ;;  %v1241_v3 = vld [vmem:[#allocation20 + $0x4] ss:$0 sm:$0xff] }
0x124c   :  { %989 = vrot.lane.b32.xlu2 %v1291_v4, %s1626_s1 }
0x1252   :  { %v845_v5 = vpop.permute.xlu1 %844 }
0x1253   :  { %848 = vst.msk [vmem:[#allocation2] sm:$0x20] %vm847_vm11, %v845_v5 }
0x1254   :  { %690 = vrot.lane.b32.xlu2 %v1904_v59, %s1626_s1  ;;  %v1014_v59 = vld [vmem:[%s1998_s10 + $0x20] sm:$0xff]  ;;  %s1627_s10 = smov [#allocation23]  }
0x1255   :  { %1030 = vmatpush.msrb.mxu1 %v1014_v59  ;;  %s1163_s9 = sshll.u32 %s1627_s10, 4  ;;  %v1243_v59 = vld [vmem:[#allocation20 + $0x6] ss:$0 sm:$0xff]  ;;  %s1164_s9 = int_to_ptr.vmem [resolvable:$true] %s1163_s9 }
0x1257   :  { %1031 = vmatpush.msrb.mxu1 %v1013_v13 }
0x1259   :  { %1032 = vmatpush.msrb.mxu1 %v1012_v16 }
0x125b   :  { %1033 = vmatpush.msrb.mxu1 %v1011_v17 }
0x125c   :  { %921 = vrot.lane.b32.xlu2 %v919_v38, %s1626_s1  ;;  %v1073_v38 = vld [vmem:[#allocation17 + $0x20] sm:$0xff] }
0x125d   :  { %1034 = vmatpush.msrb.mxu1 %v1010_v20  ;;  %1097 = vmatpush.msra.mxu3 %v1073_v38 }
0x125e   :  { %1217 = vmatmul.msk.f32.vlgmr.msrb.gmra.mxu1 %vm1015_vm14, %v1005_v21 }
0x125f   :  { %1098 = vmatpush.msra.mxu3 %v1072_v39 }
0x1261   :  { %1099 = vmatpush.msra.mxu3 %v1071_v40 }
0x1263   :  { %1100 = vmatpush.msra.mxu3 %v1070_v41 }
0x1265   :  { %1101 = vmatpush.msra.mxu3 %v1069_v42 }
0x12a6   :  { %v990_v6 = vpop.permute.xlu2 %989 }
0x12a7   :  { %v992_v60 = vmul.f32 %v990_v6, %v987_v24  ;;  %v1111_v6 = vld [vmem:[#allocation19 + $0x10] sm:$0xff] }
0x12a8   :  { %1139 = vmatpush.msra.mxu0 %v1111_v6 }
0x12a9   :  { %v996_v8 = vadd.f32 %v995_v7, %v992_v60  ;;  %v1110_v7 = vld [vmem:[#allocation19 + $0x8] sm:$0xff]  ;;  %v1109_v60 = vld [vmem:[#allocation19] sm:$0xff] }
0x12aa   :  { %1140 = vmatpush.msra.mxu0 %v1110_v7 }
0x12ab   :  { %998 = vrot.lane.b32.xlu0 %v996_v8, %s1626_s1  ;;  %v1242_v8 = vld [vmem:[#allocation20 + $0x5] ss:$0 sm:$0xff] }
0x12ac   :  { %1141 = vmatpush.msra.mxu0 %v1109_v60 }
0x12ae   :  { %v691_v9 = vpop.permute.xlu2 %690 }
0x12af   :  { %694 = vst.msk [vmem:[#allocation2] sm:$0x8] %vm693_vm12, %v691_v9 }
0x12b6   :  { %v922_v10 = vpop.permute.xlu2 %921 }
0x12b7   :  { %925 = vst.msk [vmem:[#allocation2] sm:$0x40] %vm924_vm13, %v922_v10 }
0x12db   :  { %v1036_v62 = vpop.f32.mrf.mxu1 }
0x131d   :  { %v999_v36 = vpop.permute.xlu0 %998 }
0x131e   :  { %1002 = vst.msk [vmem:[#allocation2] sm:$0x80] %vm1001_vm15, %v999_v36 }
0x131f   :  { %1003 = vst.msk [vmem:[#allocation23 - $0x7] sm:$0x80] %vm1001_vm15, %v999_v36 }
0x1320   :  { %1168 = dma.vmem_to_hbm [thread:$0]  %s1164_s9, 16, %s1166_s30, [#allocation24]  }
0x1325   :  { %v1004_v37 = vld [vmem:[#allocation2] sm:$0xff] }
0x1326   :  { %1218 = vmatmul.msk.f32.vlgmr.msrb.gmra.mxu2 %vm279_vm1, %v1004_v37 }
0x13a9   :  { %v1059_v0 = vpop.f32.mrf.mxu2 }
0x13aa   :  { %v1060_v1 = vadd.f32 %v1059_v0, %v1036_v62 }
0x13ac   :  { %v1063_v4 = vadd.f32 %v1062_v29, %v1060_v1 }
0x13ae   :  { %v1065_v5 = vadd.f32 %v1241_v3, %v1063_v4 }
0x13b0   :  { %vm1066_vm1 = vcmp.ge.f32.partialorder %v1065_v5, 0.0  ;;  %v1067_v24 = vmul.f32 0.2, %v1065_v5 }
0x13b2   :  { %v1068_v2 = vsel %vm1066_vm1, %v1065_v5, %v1067_v24 }
0x13b3   :  { %1102 = vmatmul.f32.vlgmr.msra.gmra.mxu3 %v1068_v2 }
0x1436   :  { %v1103_v9 = vpop.f32.mrf.mxu3 }
0x1437   :  { %v1104_v10 = vadd.f32 %v1242_v8, %v1103_v9 }
0x1439   :  { %vm1106_vm0 = vcmp.ge.f32.partialorder %v1104_v10, 0.0  ;;  %v1107_v11 = vmul.f32 0.2, %v1104_v10 }
0x143b   :  { %v1108_v12 = vsel %vm1106_vm0, %v1104_v10, %v1107_v11 }
0x143c   :  { %1142 = vmatmul.f32.vlgmr.msra.gmra.mxu0 %v1108_v12 }
0x14b9   :  { %v1143_v13 = vpop.f32.mrf.mxu0 }
0x14ba   :  { %v1144_v14 = vadd.f32 %v1243_v59, %v1143_v13 }
0x14bc   :  { %1146 = vst [vmem:[#allocation22] sm:$0xff] %v1144_v14 }
0x14bd   :  { %1157 = dma.vmem_to_hbm [thread:$0]  %s1153_s2, 128, %s1155_s24, [#allocation5]  }
0x14be   :  { %1607 = dma.done.wait [#allocation5], 128  }
0x14bf   :  { %1608 = vsyncadd [#allocation5], 4294967168 }
0x14c0   :  { %1609 = dma.done.wait [#allocation24], 16  }
0x14c1   :  { %1610 = vsyncadd [#allocation24], 4294967280 }
0x14c2   :  { %1177 = vsyncpa [#allocation4], 1 }
0x14c3   :  { %1178 = vsyncpa [#allocation9], 1 }
0x14c4   :  { %1179 = vsyncpa [#allocation12], 1 }
0x14c5   :  { %1180 = vsyncpa [#allocation15], 1 }
0x14c6   :  { %1181 = vsyncpa [#allocation18], 1 }
0x14c7   :  { %1182 = vsyncpa [#allocation21], 1 }
0x14c8   :  { %1183 = vsyncpa [#allocation5], 1 }
0x14c9   :  { %1184 = vsyncpa [#allocation24], 1 }
0x14ca   :  { %1185 = vsyncpa [#allocation6], 1 }

</bundles_post_ra>
